<compile_context>
chip_gen: v7x
topology: tpu7x:2x2x1
jax: 0.10.0
libtpu: 0.0.40
codegen_flags: <defaults>
</compile_context>

<pallas_src>
import functools

import jax
import jax.numpy as jnp
from jax.experimental import pallas as pl
from jax.experimental.pallas import tpu as pltpu


# --------------------------------------------------------------------------
# Kernels
# --------------------------------------------------------------------------
def _conv_bn_stats_kernel(*refs, band_h, n_bands, out_w, apply_pre):
    """One row-band of  y = conv3x3( pre(src), w ) + bias  plus per-channel
    partial [sum | sum-of-squares] of y (for training-mode BatchNorm).

    pre(src) = PReLU(src*scale + shift) when apply_pre (BN1-apply fused into
    conv2's load), identity (just a bf16 cast) otherwise (conv1)."""
    f32 = jnp.float32
    bf16 = jnp.bfloat16
    if apply_pre:
        (top_ref, band_ref, bot_ref, scale_ref, shift_ref, alpha_ref,
         w_ref, bias_ref, y_ref, stat_ref) = refs
    else:
        (top_ref, band_ref, bot_ref, w_ref, bias_ref, y_ref, stat_ref) = refs

    C = band_ref.shape[-1]
    W = out_w
    b_idx = pl.program_id(1)

    if apply_pre:
        alpha = alpha_ref[0, 0]                      # scalar (SMEM)
        scale = scale_ref[...].astype(f32)           # (1, C)
        shift = shift_ref[...].astype(f32)           # (1, C)

        def pre(v):                                  # fused BN-apply + PReLU
            v = v.astype(f32) * scale + shift
            return jnp.where(v > 0, v, alpha * v).astype(bf16)
    else:
        def pre(v):                                  # conv1: plain bf16 pass
            return v.astype(bf16)

    band = pre(band_ref[0])                          # (band_h, W, C) bf16
    top = pre(top_ref[0, 0])                         # (W, C)
    bot = pre(bot_ref[0, 0])                         # (W, C)

    # Halo rows outside the image must be the conv's zero padding (zero AFTER
    # the pre-activation); the index_map clamps them, so zero them here.
    top = jnp.where(b_idx > 0, top, jnp.zeros_like(top))
    bot = jnp.where(b_idx < n_bands - 1, bot, jnp.zeros_like(bot))

    core = jnp.concatenate([top[None], band, bot[None]], axis=0)   # (band_h+2, W, C)
    zcol = jnp.zeros((band_h + 2, 1, C), bf16)
    tile = jnp.concatenate([zcol, core, zcol], axis=1)             # (band_h+2, W+2, C)

    # Three accumulating K=3C matmuls (one per kernel row): much smaller peak
    # im2col buffer than a single 9C lhs, same result.  f32 accumulation.
    acc = jnp.zeros((band_h * W, C), f32)
    for kh in range(3):
        lhs = jnp.concatenate(
            [tile[kh:kh + band_h, kw:kw + W, :] for kw in range(3)],
            axis=-1).reshape(band_h * W, 3 * C)                    # bf16
        acc = acc + jnp.dot(lhs, w_ref[kh * 3 * C:(kh + 1) * 3 * C, :],
                            preferred_element_type=f32)
    acc = acc + bias_ref[...].astype(f32)

    y_ref[...] = acc.reshape(1, band_h, W, C).astype(y_ref.dtype)  # bf16 store
    stat = jnp.concatenate(
        [jnp.sum(acc, axis=0, keepdims=True),
         jnp.sum(acc * acc, axis=0, keepdims=True)], axis=-1)      # (1, 2C) f32
    stat_ref[...] = stat.reshape(1, 1, 1, 2 * C)


def _bn_residual_kernel(x_ref, y_ref, scale_ref, shift_ref, o_ref):
    """out = x + y * scale + shift   (BN2-apply fused with the residual).
    Operates on (1, rows, W*C) lane-dense blocks."""
    x = x_ref[...].astype(jnp.float32)
    y = y_ref[...].astype(jnp.float32)
    o_ref[...] = (x + y * scale_ref[...] + shift_ref[...]).astype(o_ref.dtype)


# --------------------------------------------------------------------------
# pallas_call builders
# --------------------------------------------------------------------------
def _conv_call(N, H, W, C, band_h, apply_pre, vmem_limit, src_dtype):
    n_bands = H // band_h

    def band_map(n, b):
        return (n, b, 0, 0)

    def row_top_map(n, b):                      # row just above the band (clamped)
        return (n, jnp.maximum(b * band_h - 1, 0), 0, 0)

    def row_bot_map(n, b):                      # row just below the band (clamped)
        return (n, jnp.minimum((b + 1) * band_h, H - 1), 0, 0)

    src_band = pl.BlockSpec((1, band_h, W, C), band_map)
    src_top = pl.BlockSpec((1, 1, W, C), row_top_map)
    src_bot = pl.BlockSpec((1, 1, W, C), row_bot_map)
    vec_c = pl.BlockSpec((1, C), lambda n, b: (0, 0))
    w_spec = pl.BlockSpec((9 * C, C), lambda n, b: (0, 0))
    stat_spec = pl.BlockSpec((1, 1, 1, 2 * C), lambda n, b: (n, b, 0, 0))

    in_specs = [src_top, src_band, src_bot]
    if apply_pre:
        smem_scalar = pl.BlockSpec(memory_space=pltpu.MemorySpace.SMEM)
        in_specs += [vec_c, vec_c, smem_scalar]
    in_specs += [w_spec, vec_c]

    kernel = functools.partial(_conv_bn_stats_kernel, band_h=band_h,
                               n_bands=n_bands, out_w=W, apply_pre=apply_pre)
    del src_dtype  # dtype is carried by the arrays, kept for clarity at call site
    return pl.pallas_call(
        kernel,
        grid=(N, n_bands),
        in_specs=in_specs,
        out_specs=[pl.BlockSpec((1, band_h, W, C), band_map), stat_spec],
        out_shape=[jax.ShapeDtypeStruct((N, H, W, C), jnp.bfloat16),
                   jax.ShapeDtypeStruct((N, n_bands, 1, 2 * C), jnp.float32)],
        compiler_params=pltpu.CompilerParams(
            dimension_semantics=("parallel", "parallel"),
            vmem_limit_bytes=vmem_limit),
    )


def _residual_call(N, H, WC, rows_r, vmem_limit):
    n_bands = H // rows_r
    band = pl.BlockSpec((1, rows_r, WC), lambda n, b: (n, b, 0))
    vec = pl.BlockSpec((1, WC), lambda n, b: (0, 0))
    return pl.pallas_call(
        _bn_residual_kernel,
        grid=(N, n_bands),
        in_specs=[band, band, vec, vec],
        out_specs=band,
        out_shape=jax.ShapeDtypeStruct((N, H, WC), jnp.float32),
        compiler_params=pltpu.CompilerParams(
            dimension_semantics=("parallel", "parallel"),
            vmem_limit_bytes=vmem_limit),
    )


# --------------------------------------------------------------------------
# Generation-aware sizing
# --------------------------------------------------------------------------
def _vmem_capacity_bytes():
    try:
        info = pltpu.get_tpu_info()
        cap = getattr(info, "vmem_capacity_bytes", None)
        if cap:
            return int(cap)
    except Exception:
        pass
    return 64 * 1024 * 1024          # conservative: v7x per-TC VMEM


def _pick_rows(H, per_row_bytes, budget_bytes, requested=None, multiple=1):
    """Largest divisor of H whose per-band working set fits the budget.
    With multiple>1 the rows must also be a multiple of it (or the full H),
    so the block's second-minor dim stays sublane-aligned."""
    cap = max(1, budget_bytes // max(per_row_bytes, 1))
    if requested is not None:
        cap = max(1, min(cap, int(requested)))
    best = None
    for d in range(1, H + 1):
        if H % d:
            continue
        if d <= cap and (multiple == 1 or d % multiple == 0):
            best = d
    if best is None:
        best = H                      # full-extent block is always layout-legal
    return best


# --------------------------------------------------------------------------
# Wrapper (PyTorch-style NCHW in / NCHW out)
# --------------------------------------------------------------------------
@functools.partial(jax.jit, static_argnums=(2, 3, 4))
def _forward(x_nchw, params, band_h, rows_r, vmem_limit):
    N, C, H, W = x_nchw.shape
    eps = 1e-5
    f32 = jnp.float32

    # TODO(synk): NCHW<->NHWC boundary transposes stay in XLA.
    x_nhwc = jnp.transpose(x_nchw, (0, 2, 3, 1)).astype(f32)   # skip path (f32)
    x_bf = x_nhwc.astype(jnp.bfloat16)                         # conv1 input (bf16)

    def conv_w(w_oihw):
        # (Cout, Cin, 3, 3) -> (9*Cin, Cout); row index = (kh*3 + kw)*Cin + cin
        return jnp.transpose(w_oihw, (2, 3, 1, 0)).reshape(9 * C, C) \
                  .astype(jnp.bfloat16)

    def vec(p):
        return p.reshape(1, C).astype(f32)

    count = float(N * H * W)
    n_b = float(band_h * W)           # elements per (image, band) per channel

    def bn_fold(stats, gamma, beta):
        # Per-band mean/M2 + Chan combination (more stable than global
        # E[y^2]-E[y]^2 for large N*H*W).
        st = stats.reshape(-1, 2 * C)
        s, ss = st[:, :C], st[:, C:]
        mean_b = s / n_b
        m2_b = jnp.maximum(ss - s * mean_b, 0.0)
        mean = jnp.sum(s, axis=0) / count
        m2 = jnp.sum(m2_b, axis=0) + n_b * jnp.sum((mean_b - mean) ** 2, axis=0)
        var = m2 / count                                    # biased variance
        inv = jax.lax.rsqrt(var + eps)
        scale = gamma.astype(f32) * inv
        shift = beta.astype(f32) - mean * scale
        return scale.reshape(1, C), shift.reshape(1, C)

    conv1 = _conv_call(N, H, W, C, band_h, False, vmem_limit, jnp.bfloat16)
    conv2 = _conv_call(N, H, W, C, band_h, True, vmem_limit, jnp.bfloat16)
    resid = _residual_call(N, H, W * C, rows_r, vmem_limit)

    alpha = params["alpha"].reshape(1, 1).astype(f32)

    # Conv1 (+ fused BN1 statistics); no pre-activation path in this kernel.
    y1, st1 = conv1(x_bf, x_bf, x_bf, conv_w(params["w1"]), vec(params["b1"]))
    scale1, shift1 = bn_fold(st1, params["gamma1"], params["beta1"])

    # BN1 + PReLU fused into conv2's load; Conv2 (+ fused BN2 statistics).
    y2, st2 = conv2(y1, y1, y1, scale1, shift1, alpha,
                    conv_w(params["w2"]), vec(params["b2"]))
    scale2, shift2 = bn_fold(st2, params["gamma2"], params["beta2"])

    # BN2 + residual add, lane-dense (N, H, W*C) layout with its own big band.
    out = resid(x_nhwc.reshape(N, H, W * C),
                y2.reshape(N, H, W * C),
                jnp.tile(scale2, (1, W)), jnp.tile(shift2, (1, W)))
    out = out.reshape(N, H, W, C)
    return jnp.transpose(out, (0, 3, 1, 2)).astype(x_nchw.dtype)


def nesrgan_residual_block(x_nchw, params, band_rows=None):
    N, C, H, W = x_nchw.shape
    cap = _vmem_capacity_bytes()
    # Conv band budget (bf16 im2col, ~36 B / output element working set):
    # ~8 MiB on 64 MiB-VMEM v7x, ~16 MiB on 128 MiB v5e/v6e.
    conv_budget = max(4 << 20, cap // 8)
    resid_budget = max(8 << 20, cap // 8)
    vmem_limit = min(int(cap * 3 // 4), 96 << 20)

    band_h = _pick_rows(H, 36 * W * C, conv_budget, requested=band_rows)
    rows_r = _pick_rows(H, 32 * W * C, resid_budget, multiple=8)
    return _forward(x_nchw, params, band_h, rows_r, vmem_limit)


# --------------------------------------------------------------------------
# Parameters / reference / demo
# --------------------------------------------------------------------------
def make_params(key, channels):
    ks = jax.random.split(key, 4)
    scale = 1.0 / jnp.sqrt(channels * 9.0)
    return {
        "w1": jax.random.uniform(ks[0], (channels, channels, 3, 3),
                                 jnp.float32, -scale, scale),
        "b1": jax.random.uniform(ks[1], (channels,), jnp.float32, -scale, scale),
        "gamma1": jnp.ones((channels,), jnp.float32),
        "beta1": jnp.zeros((channels,), jnp.float32),
        "alpha": jnp.full((1,), 0.25, jnp.float32),           # PReLU default
        "w2": jax.random.uniform(ks[2], (channels, channels, 3, 3),
                                 jnp.float32, -scale, scale),
        "b2": jax.random.uniform(ks[3], (channels,), jnp.float32, -scale, scale),
        "gamma2": jnp.ones((channels,), jnp.float32),
        "beta2": jnp.zeros((channels,), jnp.float32),
    }


def _reference(x_nchw, params, eps=1e-5):
    """Pure-JAX f32 reference of the PyTorch module (training-mode BN)."""
    x = jnp.transpose(x_nchw, (0, 2, 3, 1)).astype(jnp.float32)

    def conv(v, w, b):
        out = jax.lax.conv_general_dilated(
            v, jnp.transpose(w, (2, 3, 1, 0)), window_strides=(1, 1),
            padding="SAME", dimension_numbers=("NHWC", "HWIO", "NHWC"))
        return out + b

    def bn(v, g, be):
        mean = jnp.mean(v, axis=(0, 1, 2))
        var = jnp.mean((v - mean) ** 2, axis=(0, 1, 2))
        return (v - mean) * jax.lax.rsqrt(var + eps) * g + be

    y = bn(conv(x, params["w1"], params["b1"]), params["gamma1"], params["beta1"])
    y = jnp.where(y > 0, y, params["alpha"] * y)
    y = bn(conv(y, params["w2"], params["b2"]), params["gamma2"], params["beta2"])
    return jnp.transpose(x + y, (0, 3, 1, 2))


if __name__ == "__main__":
    key = jax.random.PRNGKey(0)
    k_x, k_p = jax.random.split(key)

    N, C, H, W = 2, 4, 16, 16
    x = jax.random.normal(k_x, (N, C, H, W), jnp.float32)
    params = make_params(k_p, C)

    out = nesrgan_residual_block(x, params, band_rows=8)   # grid = (2 images, 2 bands)
    jax.block_until_ready(out)
    assert out.shape == (N, C, H, W), out.shape

    ref = _reference(x, params)
    err = float(jnp.max(jnp.abs(out - ref)))
    assert err < 1e-1, f"max abs error vs reference: {err}"

    print("KERNEL_OK")
</pallas_src>

<mosaic_0001>
module attributes {stable_mosaic.version = 11 : i64} {
  func.func @_conv_bn_stats_kernel(%arg0: i32, %arg1: i32, %arg2: memref<1x1x16x4xbf16, #tpu.memory_space<vmem>>, %arg3: memref<1x8x16x4xbf16, #tpu.memory_space<vmem>>, %arg4: memref<1x1x16x4xbf16, #tpu.memory_space<vmem>>, %arg5: memref<36x4xbf16, #tpu.memory_space<vmem>>, %arg6: memref<1x4xf32, #tpu.memory_space<vmem>>, %arg7: memref<1x8x16x4xbf16, #tpu.memory_space<vmem>>, %arg8: memref<1x1x1x8xf32, #tpu.memory_space<vmem>>) attributes {dimension_semantics = [#tpu.dimension_semantics<parallel>, #tpu.dimension_semantics<parallel>], iteration_bounds = array<i64: 2, 2>, scalar_prefetch = 0 : i64, scratch_operands = 0 : i64, tpu.core_type = #tpu.core_type<tc>, window_params = [{transform_indices = @transform_0, window_bounds = array<i64: 1, 1, 16, 4>}, {transform_indices = @transform_1, window_bounds = array<i64: 1, 8, 16, 4>}, {transform_indices = @transform_2, window_bounds = array<i64: 1, 1, 16, 4>}, {pipeline_mode = #tpu.pipeline_mode<synchronous>, transform_indices = @transform_3, window_bounds = array<i64: 36, 4>}, {pipeline_mode = #tpu.pipeline_mode<synchronous>, transform_indices = @transform_4, window_bounds = array<i64: 1, 4>}, {transform_indices = @transform_5, window_bounds = array<i64: 1, 8, 16, 4>}, {transform_indices = @transform_6, window_bounds = array<i64: 1, 1, 1, 8>}]} {
    %c0 = arith.constant 0 : index
    %c0_0 = arith.constant 0 : index
    %c0_1 = arith.constant 0 : index
    %c0_2 = arith.constant 0 : index
    %0 = vector.load %arg3[%c0, %c0_0, %c0_1, %c0_2] : memref<1x8x16x4xbf16, #tpu.memory_space<vmem>>, vector<1x8x16x4xbf16>
    %1 = vector.shape_cast %0 : vector<1x8x16x4xbf16> to vector<8x16x4xbf16>
    %c0_3 = arith.constant 0 : index
    %c0_4 = arith.constant 0 : index
    %c0_5 = arith.constant 0 : index
    %c0_6 = arith.constant 0 : index
    %2 = vector.load %arg2[%c0_3, %c0_4, %c0_5, %c0_6] : memref<1x1x16x4xbf16, #tpu.memory_space<vmem>>, vector<1x1x16x4xbf16>
    %3 = vector.shape_cast %2 : vector<1x1x16x4xbf16> to vector<16x4xbf16>
    %c0_7 = arith.constant 0 : index
    %c0_8 = arith.constant 0 : index
    %c0_9 = arith.constant 0 : index
    %c0_10 = arith.constant 0 : index
    %4 = vector.load %arg4[%c0_7, %c0_8, %c0_9, %c0_10] : memref<1x1x16x4xbf16, #tpu.memory_space<vmem>>, vector<1x1x16x4xbf16>
    %5 = vector.shape_cast %4 : vector<1x1x16x4xbf16> to vector<16x4xbf16>
    %c0_i32 = arith.constant 0 : i32
    %6 = arith.cmpi sgt, %arg1, %c0_i32 : i32
    %cst = arith.constant 0.000000e+00 : bf16
    %7 = vector.broadcast %cst : bf16 to vector<16x4xbf16>
    %8 = arith.select %6, %3, %7 : vector<16x4xbf16>
    %c1_i32 = arith.constant 1 : i32
    %9 = arith.cmpi slt, %arg1, %c1_i32 : i32
    %cst_11 = arith.constant 0.000000e+00 : bf16
    %10 = vector.broadcast %cst_11 : bf16 to vector<16x4xbf16>
    %11 = arith.select %9, %5, %10 : vector<16x4xbf16>
    %12 = vector.shape_cast %8 : vector<16x4xbf16> to vector<1x16x4xbf16>
    %13 = vector.shape_cast %11 : vector<16x4xbf16> to vector<1x16x4xbf16>
    %14 = tpu.concatenate %12, %1, %13 in 0 : vector<1x16x4xbf16>, vector<8x16x4xbf16>, vector<1x16x4xbf16> -> vector<10x16x4xbf16>
    %cst_12 = arith.constant 0.000000e+00 : bf16
    %15 = vector.broadcast %cst_12 : bf16 to vector<10x1x4xbf16>
    %16 = tpu.concatenate %15, %14, %15 in 1 : vector<10x1x4xbf16>, vector<10x16x4xbf16>, vector<10x1x4xbf16> -> vector<10x18x4xbf16>
    %cst_13 = arith.constant 0.000000e+00 : f32
    %17 = vector.broadcast %cst_13 : f32 to vector<128x4xf32>
    %18 = vector.extract_strided_slice %16 {offsets = [0, 0, 0], sizes = [8, 16, 4], strides = [1, 1, 1]} : vector<10x18x4xbf16> to vector<8x16x4xbf16>
    %19 = vector.extract_strided_slice %16 {offsets = [0, 1, 0], sizes = [8, 16, 4], strides = [1, 1, 1]} : vector<10x18x4xbf16> to vector<8x16x4xbf16>
    %20 = vector.extract_strided_slice %16 {offsets = [0, 2, 0], sizes = [8, 16, 4], strides = [1, 1, 1]} : vector<10x18x4xbf16> to vector<8x16x4xbf16>
    %21 = tpu.concatenate %18, %19, %20 in 2 : vector<8x16x4xbf16>, vector<8x16x4xbf16>, vector<8x16x4xbf16> -> vector<8x16x12xbf16>
    %22 = vector.shape_cast %21 : vector<8x16x12xbf16> to vector<128x12xbf16>
    %c0_14 = arith.constant 0 : index
    %c0_15 = arith.constant 0 : index
    %23 = vector.load %arg5[%c0_14, %c0_15] : memref<36x4xbf16, #tpu.memory_space<vmem>>, vector<12x4xbf16>
    %cst_16 = arith.constant dense<0.000000e+00> : vector<128x4xf32>
    %24 = tpu.matmul %22, %23, %cst_16 {dimension_numbers = #tpu.dot_dimension_numbers<[1], [0], [0], [1], [0, 0, 1, 1], [], []>} : vector<128x12xbf16>, vector<12x4xbf16>, vector<128x4xf32> -> vector<128x4xf32>
    %25 = arith.addf %17, %24 : vector<128x4xf32>
    %26 = vector.extract_strided_slice %16 {offsets = [1, 0, 0], sizes = [8, 16, 4], strides = [1, 1, 1]} : vector<10x18x4xbf16> to vector<8x16x4xbf16>
    %27 = vector.extract_strided_slice %16 {offsets = [1, 1, 0], sizes = [8, 16, 4], strides = [1, 1, 1]} : vector<10x18x4xbf16> to vector<8x16x4xbf16>
    %28 = vector.extract_strided_slice %16 {offsets = [1, 2, 0], sizes = [8, 16, 4], strides = [1, 1, 1]} : vector<10x18x4xbf16> to vector<8x16x4xbf16>
    %29 = tpu.concatenate %26, %27, %28 in 2 : vector<8x16x4xbf16>, vector<8x16x4xbf16>, vector<8x16x4xbf16> -> vector<8x16x12xbf16>
    %30 = vector.shape_cast %29 : vector<8x16x12xbf16> to vector<128x12xbf16>
    %c12 = arith.constant 12 : index
    %c0_17 = arith.constant 0 : index
    %31 = vector.load %arg5[%c12, %c0_17] : memref<36x4xbf16, #tpu.memory_space<vmem>>, vector<12x4xbf16>
    %cst_18 = arith.constant dense<0.000000e+00> : vector<128x4xf32>
    %32 = tpu.matmul %30, %31, %cst_18 {dimension_numbers = #tpu.dot_dimension_numbers<[1], [0], [0], [1], [0, 0, 1, 1], [], []>} : vector<128x12xbf16>, vector<12x4xbf16>, vector<128x4xf32> -> vector<128x4xf32>
    %33 = arith.addf %25, %32 : vector<128x4xf32>
    %34 = vector.extract_strided_slice %16 {offsets = [2, 0, 0], sizes = [8, 16, 4], strides = [1, 1, 1]} : vector<10x18x4xbf16> to vector<8x16x4xbf16>
    %35 = vector.extract_strided_slice %16 {offsets = [2, 1, 0], sizes = [8, 16, 4], strides = [1, 1, 1]} : vector<10x18x4xbf16> to vector<8x16x4xbf16>
    %36 = vector.extract_strided_slice %16 {offsets = [2, 2, 0], sizes = [8, 16, 4], strides = [1, 1, 1]} : vector<10x18x4xbf16> to vector<8x16x4xbf16>
    %37 = tpu.concatenate %34, %35, %36 in 2 : vector<8x16x4xbf16>, vector<8x16x4xbf16>, vector<8x16x4xbf16> -> vector<8x16x12xbf16>
    %38 = vector.shape_cast %37 : vector<8x16x12xbf16> to vector<128x12xbf16>
    %c24 = arith.constant 24 : index
    %c0_19 = arith.constant 0 : index
    %39 = vector.load %arg5[%c24, %c0_19] : memref<36x4xbf16, #tpu.memory_space<vmem>>, vector<12x4xbf16>
    %cst_20 = arith.constant dense<0.000000e+00> : vector<128x4xf32>
    %40 = tpu.matmul %38, %39, %cst_20 {dimension_numbers = #tpu.dot_dimension_numbers<[1], [0], [0], [1], [0, 0, 1, 1], [], []>} : vector<128x12xbf16>, vector<12x4xbf16>, vector<128x4xf32> -> vector<128x4xf32>
    %41 = arith.addf %33, %40 : vector<128x4xf32>
    %c0_21 = arith.constant 0 : index
    %c0_22 = arith.constant 0 : index
    %42 = vector.load %arg6[%c0_21, %c0_22] : memref<1x4xf32, #tpu.memory_space<vmem>>, vector<1x4xf32>
    %43 = vector.broadcast %42 : vector<1x4xf32> to vector<128x4xf32>
    %44 = arith.addf %41, %43 : vector<128x4xf32>
    %45 = vector.shape_cast %44 : vector<128x4xf32> to vector<1x8x16x4xf32>
    %46 = arith.truncf %45 : vector<1x8x16x4xf32> to vector<1x8x16x4xbf16>
    %c0_23 = arith.constant 0 : index
    %c0_24 = arith.constant 0 : index
    %c0_25 = arith.constant 0 : index
    %c0_26 = arith.constant 0 : index
    %47 = vector.load %arg7[%c0_23, %c0_24, %c0_25, %c0_26] : memref<1x8x16x4xbf16, #tpu.memory_space<vmem>>, vector<1x8x16x4xbf16>
    tpu.vector_store %arg7[%c0_23, %c0_24, %c0_25, %c0_26], %46 {strides = array<i32>} : memref<1x8x16x4xbf16, #tpu.memory_space<vmem>>, vector<1x8x16x4xbf16>,
    %cst_27 = arith.constant dense<0.000000e+00> : vector<4xf32>
    %48 = vector.multi_reduction <add>, %44, %cst_27 [0] : vector<128x4xf32> to vector<4xf32>
    %49 = vector.shape_cast %48 : vector<4xf32> to vector<1x4xf32>
    %50 = arith.mulf %44, %44 : vector<128x4xf32>
    %cst_28 = arith.constant dense<0.000000e+00> : vector<4xf32>
    %51 = vector.multi_reduction <add>, %50, %cst_28 [0] : vector<128x4xf32> to vector<4xf32>
    %52 = vector.shape_cast %51 : vector<4xf32> to vector<1x4xf32>
    %53 = tpu.concatenate %49, %52 in 1 : vector<1x4xf32>, vector<1x4xf32> -> vector<1x8xf32>
    %54 = vector.shape_cast %53 : vector<1x8xf32> to vector<1x1x1x8xf32>
    %c0_29 = arith.constant 0 : index
    %c0_30 = arith.constant 0 : index
    %c0_31 = arith.constant 0 : index
    %c0_32 = arith.constant 0 : index
    %55 = vector.load %arg8[%c0_29, %c0_30, %c0_31, %c0_32] : memref<1x1x1x8xf32, #tpu.memory_space<vmem>>, vector<1x1x1x8xf32>
    tpu.vector_store %arg8[%c0_29, %c0_30, %c0_31, %c0_32], %54 {strides = array<i32>} : memref<1x1x1x8xf32, #tpu.memory_space<vmem>>, vector<1x1x1x8xf32>,
    return
  }
  func.func @transform_0(%arg0: i32, %arg1: i32) -> (i32, i32, i32, i32) {
    %c8_i32 = arith.constant 8 : i32
    %0 = arith.muli %arg1, %c8_i32 : i32
    %c1_i32 = arith.constant 1 : i32
    %1 = arith.subi %0, %c1_i32 : i32
    %c0_i32 = arith.constant 0 : i32
    %2 = arith.maxsi %1, %c0_i32 : i32
    %c0_i32_0 = arith.constant 0 : i32
    %c0_i32_1 = arith.constant 0 : i32
    %c0_i32_2 = arith.constant 0 : i32
    return %arg0, %2, %c0_i32_0, %c0_i32_1 : i32, i32, i32, i32
  }
  func.func @transform_1(%arg0: i32, %arg1: i32) -> (i32, i32, i32, i32) {
    %c0_i32 = arith.constant 0 : i32
    %c0_i32_0 = arith.constant 0 : i32
    %c0_i32_1 = arith.constant 0 : i32
    return %arg0, %arg1, %c0_i32, %c0_i32_0 : i32, i32, i32, i32
  }
  func.func @transform_2(%arg0: i32, %arg1: i32) -> (i32, i32, i32, i32) {
    %c1_i32 = arith.constant 1 : i32
    %0 = arith.addi %arg1, %c1_i32 : i32
    %c8_i32 = arith.constant 8 : i32
    %1 = arith.muli %0, %c8_i32 : i32
    %c15_i32 = arith.constant 15 : i32
    %2 = arith.minsi %1, %c15_i32 : i32
    %c0_i32 = arith.constant 0 : i32
    %c0_i32_0 = arith.constant 0 : i32
    %c0_i32_1 = arith.constant 0 : i32
    return %arg0, %2, %c0_i32, %c0_i32_0 : i32, i32, i32, i32
  }
  func.func @transform_3(%arg0: i32, %arg1: i32) -> (i32, i32) {
    %c0_i32 = arith.constant 0 : i32
    %c0_i32_0 = arith.constant 0 : i32
    %c0_i32_1 = arith.constant 0 : i32
    return %c0_i32, %c0_i32_0 : i32, i32
  }
  func.func @transform_4(%arg0: i32, %arg1: i32) -> (i32, i32) {
    %c0_i32 = arith.constant 0 : i32
    %c0_i32_0 = arith.constant 0 : i32
    %c0_i32_1 = arith.constant 0 : i32
    return %c0_i32, %c0_i32_0 : i32, i32
  }
  func.func @transform_5(%arg0: i32, %arg1: i32) -> (i32, i32, i32, i32) {
    %c0_i32 = arith.constant 0 : i32
    %c0_i32_0 = arith.constant 0 : i32
    %c0_i32_1 = arith.constant 0 : i32
    return %arg0, %arg1, %c0_i32, %c0_i32_0 : i32, i32, i32, i32
  }
  func.func @transform_6(%arg0: i32, %arg1: i32) -> (i32, i32, i32, i32) {
    %c0_i32 = arith.constant 0 : i32
    %c0_i32_0 = arith.constant 0 : i32
    %c0_i32_1 = arith.constant 0 : i32
    return %arg0, %arg1, %c0_i32, %c0_i32_0 : i32, i32, i32, i32
  }
}

module attributes {stable_mosaic.version = 11 : i64} {
  func.func @_conv_bn_stats_kernel(%arg0: i32, %arg1: i32, %arg2: memref<1x1x16x4xbf16, #tpu.memory_space<vmem>>, %arg3: memref<1x8x16x4xbf16, #tpu.memory_space<vmem>>, %arg4: memref<1x1x16x4xbf16, #tpu.memory_space<vmem>>, %arg5: memref<1x4xf32, #tpu.memory_space<vmem>>, %arg6: memref<1x4xf32, #tpu.memory_space<vmem>>, %arg7: memref<1x1xf32, #tpu.memory_space<smem>>, %arg8: memref<36x4xbf16, #tpu.memory_space<vmem>>, %arg9: memref<1x4xf32, #tpu.memory_space<vmem>>, %arg10: memref<1x8x16x4xbf16, #tpu.memory_space<vmem>>, %arg11: memref<1x1x1x8xf32, #tpu.memory_space<vmem>>) attributes {dimension_semantics = [#tpu.dimension_semantics<parallel>, #tpu.dimension_semantics<parallel>], iteration_bounds = array<i64: 2, 2>, scalar_prefetch = 0 : i64, scratch_operands = 0 : i64, tpu.core_type = #tpu.core_type<tc>, window_params = [{transform_indices = @transform_0, window_bounds = array<i64: 1, 1, 16, 4>}, {transform_indices = @transform_1, window_bounds = array<i64: 1, 8, 16, 4>}, {transform_indices = @transform_2, window_bounds = array<i64: 1, 1, 16, 4>}, {pipeline_mode = #tpu.pipeline_mode<synchronous>, transform_indices = @transform_3, window_bounds = array<i64: 1, 4>}, {pipeline_mode = #tpu.pipeline_mode<synchronous>, transform_indices = @transform_4, window_bounds = array<i64: 1, 4>}, {transform_indices = @transform_5, window_bounds = array<i64: 1, 1>}, {pipeline_mode = #tpu.pipeline_mode<synchronous>, transform_indices = @transform_6, window_bounds = array<i64: 36, 4>}, {pipeline_mode = #tpu.pipeline_mode<synchronous>, transform_indices = @transform_7, window_bounds = array<i64: 1, 4>}, {transform_indices = @transform_8, window_bounds = array<i64: 1, 8, 16, 4>}, {transform_indices = @transform_9, window_bounds = array<i64: 1, 1, 1, 8>}]} {
    %c0 = arith.constant 0 : index
    %c0_0 = arith.constant 0 : index
    %0 = memref.load %arg7[%c0, %c0_0] : memref<1x1xf32, #tpu.memory_space<smem>>
    %c0_1 = arith.constant 0 : index
    %c0_2 = arith.constant 0 : index
    %1 = vector.load %arg5[%c0_1, %c0_2] : memref<1x4xf32, #tpu.memory_space<vmem>>, vector<1x4xf32>
    %c0_3 = arith.constant 0 : index
    %c0_4 = arith.constant 0 : index
    %2 = vector.load %arg6[%c0_3, %c0_4] : memref<1x4xf32, #tpu.memory_space<vmem>>, vector<1x4xf32>
    %c0_5 = arith.constant 0 : index
    %c0_6 = arith.constant 0 : index
    %c0_7 = arith.constant 0 : index
    %c0_8 = arith.constant 0 : index
    %3 = vector.load %arg3[%c0_5, %c0_6, %c0_7, %c0_8] : memref<1x8x16x4xbf16, #tpu.memory_space<vmem>>, vector<1x8x16x4xbf16>
    %4 = vector.shape_cast %3 : vector<1x8x16x4xbf16> to vector<8x16x4xbf16>
    %5 = arith.extf %4 : vector<8x16x4xbf16> to vector<8x16x4xf32>
    %6 = vector.shape_cast %1 : vector<1x4xf32> to vector<1x1x4xf32>
    %7 = vector.broadcast %6 : vector<1x1x4xf32> to vector<8x16x4xf32>
    %8 = arith.mulf %5, %7 : vector<8x16x4xf32>
    %9 = vector.shape_cast %2 : vector<1x4xf32> to vector<1x1x4xf32>
    %10 = vector.broadcast %9 : vector<1x1x4xf32> to vector<8x16x4xf32>
    %11 = arith.addf %8, %10 : vector<8x16x4xf32>
    %cst = arith.constant 0.000000e+00 : f32
    %12 = vector.broadcast %cst : f32 to vector<8x16x4xf32>
    %13 = arith.cmpf ogt, %11, %12 : vector<8x16x4xf32>
    %14 = vector.broadcast %0 : f32 to vector<8x16x4xf32>
    %15 = arith.mulf %14, %11 : vector<8x16x4xf32>
    %16 = arith.select %13, %11, %15 : vector<8x16x4xi1>, vector<8x16x4xf32>
    %17 = arith.truncf %16 : vector<8x16x4xf32> to vector<8x16x4xbf16>
    %c0_9 = arith.constant 0 : index
    %c0_10 = arith.constant 0 : index
    %c0_11 = arith.constant 0 : index
    %c0_12 = arith.constant 0 : index
    %18 = vector.load %arg2[%c0_9, %c0_10, %c0_11, %c0_12] : memref<1x1x16x4xbf16, #tpu.memory_space<vmem>>, vector<1x1x16x4xbf16>
    %19 = vector.shape_cast %18 : vector<1x1x16x4xbf16> to vector<16x4xbf16>
    %20 = arith.extf %19 : vector<16x4xbf16> to vector<16x4xf32>
    %21 = vector.broadcast %1 : vector<1x4xf32> to vector<16x4xf32>
    %22 = arith.mulf %20, %21 : vector<16x4xf32>
    %23 = vector.broadcast %2 : vector<1x4xf32> to vector<16x4xf32>
    %24 = arith.addf %22, %23 : vector<16x4xf32>
    %cst_13 = arith.constant 0.000000e+00 : f32
    %25 = vector.broadcast %cst_13 : f32 to vector<16x4xf32>
    %26 = arith.cmpf ogt, %24, %25 : vector<16x4xf32>
    %27 = vector.broadcast %0 : f32 to vector<16x4xf32>
    %28 = arith.mulf %27, %24 : vector<16x4xf32>
    %29 = arith.select %26, %24, %28 : vector<16x4xi1>, vector<16x4xf32>
    %30 = arith.truncf %29 : vector<16x4xf32> to vector<16x4xbf16>
    %c0_14 = arith.constant 0 : index
    %c0_15 = arith.constant 0 : index
    %c0_16 = arith.constant 0 : index
    %c0_17 = arith.constant 0 : index
    %31 = vector.load %arg4[%c0_14, %c0_15, %c0_16, %c0_17] : memref<1x1x16x4xbf16, #tpu.memory_space<vmem>>, vector<1x1x16x4xbf16>
    %32 = vector.shape_cast %31 : vector<1x1x16x4xbf16> to vector<16x4xbf16>
    %33 = arith.extf %32 : vector<16x4xbf16> to vector<16x4xf32>
    %34 = vector.broadcast %1 : vector<1x4xf32> to vector<16x4xf32>
    %35 = arith.mulf %33, %34 : vector<16x4xf32>
    %36 = vector.broadcast %2 : vector<1x4xf32> to vector<16x4xf32>
    %37 = arith.addf %35, %36 : vector<16x4xf32>
    %cst_18 = arith.constant 0.000000e+00 : f32
    %38 = vector.broadcast %cst_18 : f32 to vector<16x4xf32>
    %39 = arith.cmpf ogt, %37, %38 : vector<16x4xf32>
    %40 = vector.broadcast %0 : f32 to vector<16x4xf32>
    %41 = arith.mulf %40, %37 : vector<16x4xf32>
    %42 = arith.select %39, %37, %41 : vector<16x4xi1>, vector<16x4xf32>
    %43 = arith.truncf %42 : vector<16x4xf32> to vector<16x4xbf16>
    %c0_i32 = arith.constant 0 : i32
    %44 = arith.cmpi sgt, %arg1, %c0_i32 : i32
    %cst_19 = arith.constant 0.000000e+00 : bf16
    %45 = vector.broadcast %cst_19 : bf16 to vector<16x4xbf16>
    %46 = arith.select %44, %30, %45 : vector<16x4xbf16>
    %c1_i32 = arith.constant 1 : i32
    %47 = arith.cmpi slt, %arg1, %c1_i32 : i32
    %cst_20 = arith.constant 0.000000e+00 : bf16
    %48 = vector.broadcast %cst_20 : bf16 to vector<16x4xbf16>
    %49 = arith.select %47, %43, %48 : vector<16x4xbf16>
    %50 = vector.shape_cast %46 : vector<16x4xbf16> to vector<1x16x4xbf16>
    %51 = vector.shape_cast %49 : vector<16x4xbf16> to vector<1x16x4xbf16>
    %52 = tpu.concatenate %50, %17, %51 in 0 : vector<1x16x4xbf16>, vector<8x16x4xbf16>, vector<1x16x4xbf16> -> vector<10x16x4xbf16>
    %cst_21 = arith.constant 0.000000e+00 : bf16
    %53 = vector.broadcast %cst_21 : bf16 to vector<10x1x4xbf16>
    %54 = tpu.concatenate %53, %52, %53 in 1 : vector<10x1x4xbf16>, vector<10x16x4xbf16>, vector<10x1x4xbf16> -> vector<10x18x4xbf16>
    %cst_22 = arith.constant 0.000000e+00 : f32
    %55 = vector.broadcast %cst_22 : f32 to vector<128x4xf32>
    %56 = vector.extract_strided_slice %54 {offsets = [0, 0, 0], sizes = [8, 16, 4], strides = [1, 1, 1]} : vector<10x18x4xbf16> to vector<8x16x4xbf16>
    %57 = vector.extract_strided_slice %54 {offsets = [0, 1, 0], sizes = [8, 16, 4], strides = [1, 1, 1]} : vector<10x18x4xbf16> to vector<8x16x4xbf16>
    %58 = vector.extract_strided_slice %54 {offsets = [0, 2, 0], sizes = [8, 16, 4], strides = [1, 1, 1]} : vector<10x18x4xbf16> to vector<8x16x4xbf16>
    %59 = tpu.concatenate %56, %57, %58 in 2 : vector<8x16x4xbf16>, vector<8x16x4xbf16>, vector<8x16x4xbf16> -> vector<8x16x12xbf16>
    %60 = vector.shape_cast %59 : vector<8x16x12xbf16> to vector<128x12xbf16>
    %c0_23 = arith.constant 0 : index
    %c0_24 = arith.constant 0 : index
    %61 = vector.load %arg8[%c0_23, %c0_24] : memref<36x4xbf16, #tpu.memory_space<vmem>>, vector<12x4xbf16>
    %cst_25 = arith.constant dense<0.000000e+00> : vector<128x4xf32>
    %62 = tpu.matmul %60, %61, %cst_25 {dimension_numbers = #tpu.dot_dimension_numbers<[1], [0], [0], [1], [0, 0, 1, 1], [], []>} : vector<128x12xbf16>, vector<12x4xbf16>, vector<128x4xf32> -> vector<128x4xf32>
    %63 = arith.addf %55, %62 : vector<128x4xf32>
    %64 = vector.extract_strided_slice %54 {offsets = [1, 0, 0], sizes = [8, 16, 4], strides = [1, 1, 1]} : vector<10x18x4xbf16> to vector<8x16x4xbf16>
    %65 = vector.extract_strided_slice %54 {offsets = [1, 1, 0], sizes = [8, 16, 4], strides = [1, 1, 1]} : vector<10x18x4xbf16> to vector<8x16x4xbf16>
    %66 = vector.extract_strided_slice %54 {offsets = [1, 2, 0], sizes = [8, 16, 4], strides = [1, 1, 1]} : vector<10x18x4xbf16> to vector<8x16x4xbf16>
    %67 = tpu.concatenate %64, %65, %66 in 2 : vector<8x16x4xbf16>, vector<8x16x4xbf16>, vector<8x16x4xbf16> -> vector<8x16x12xbf16>
    %68 = vector.shape_cast %67 : vector<8x16x12xbf16> to vector<128x12xbf16>
    %c12 = arith.constant 12 : index
    %c0_26 = arith.constant 0 : index
    %69 = vector.load %arg8[%c12, %c0_26] : memref<36x4xbf16, #tpu.memory_space<vmem>>, vector<12x4xbf16>
    %cst_27 = arith.constant dense<0.000000e+00> : vector<128x4xf32>
    %70 = tpu.matmul %68, %69, %cst_27 {dimension_numbers = #tpu.dot_dimension_numbers<[1], [0], [0], [1], [0, 0, 1, 1], [], []>} : vector<128x12xbf16>, vector<12x4xbf16>, vector<128x4xf32> -> vector<128x4xf32>
    %71 = arith.addf %63, %70 : vector<128x4xf32>
    %72 = vector.extract_strided_slice %54 {offsets = [2, 0, 0], sizes = [8, 16, 4], strides = [1, 1, 1]} : vector<10x18x4xbf16> to vector<8x16x4xbf16>
    %73 = vector.extract_strided_slice %54 {offsets = [2, 1, 0], sizes = [8, 16, 4], strides = [1, 1, 1]} : vector<10x18x4xbf16> to vector<8x16x4xbf16>
    %74 = vector.extract_strided_slice %54 {offsets = [2, 2, 0], sizes = [8, 16, 4], strides = [1, 1, 1]} : vector<10x18x4xbf16> to vector<8x16x4xbf16>
    %75 = tpu.concatenate %72, %73, %74 in 2 : vector<8x16x4xbf16>, vector<8x16x4xbf16>, vector<8x16x4xbf16> -> vector<8x16x12xbf16>
    %76 = vector.shape_cast %75 : vector<8x16x12xbf16> to vector<128x12xbf16>
    %c24 = arith.constant 24 : index
    %c0_28 = arith.constant 0 : index
    %77 = vector.load %arg8[%c24, %c0_28] : memref<36x4xbf16, #tpu.memory_space<vmem>>, vector<12x4xbf16>
    %cst_29 = arith.constant dense<0.000000e+00> : vector<128x4xf32>
    %78 = tpu.matmul %76, %77, %cst_29 {dimension_numbers = #tpu.dot_dimension_numbers<[1], [0], [0], [1], [0, 0, 1, 1], [], []>} : vector<128x12xbf16>, vector<12x4xbf16>, vector<128x4xf32> -> vector<128x4xf32>
    %79 = arith.addf %71, %78 : vector<128x4xf32>
    %c0_30 = arith.constant 0 : index
    %c0_31 = arith.constant 0 : index
    %80 = vector.load %arg9[%c0_30, %c0_31] : memref<1x4xf32, #tpu.memory_space<vmem>>, vector<1x4xf32>
    %81 = vector.broadcast %80 : vector<1x4xf32> to vector<128x4xf32>
    %82 = arith.addf %79, %81 : vector<128x4xf32>
    %83 = vector.shape_cast %82 : vector<128x4xf32> to vector<1x8x16x4xf32>
    %84 = arith.truncf %83 : vector<1x8x16x4xf32> to vector<1x8x16x4xbf16>
    %c0_32 = arith.constant 0 : index
    %c0_33 = arith.constant 0 : index
    %c0_34 = arith.constant 0 : index
    %c0_35 = arith.constant 0 : index
    %85 = vector.load %arg10[%c0_32, %c0_33, %c0_34, %c0_35] : memref<1x8x16x4xbf16, #tpu.memory_space<vmem>>, vector<1x8x16x4xbf16>
    tpu.vector_store %arg10[%c0_32, %c0_33, %c0_34, %c0_35], %84 {strides = array<i32>} : memref<1x8x16x4xbf16, #tpu.memory_space<vmem>>, vector<1x8x16x4xbf16>,
    %cst_36 = arith.constant dense<0.000000e+00> : vector<4xf32>
    %86 = vector.multi_reduction <add>, %82, %cst_36 [0] : vector<128x4xf32> to vector<4xf32>
    %87 = vector.shape_cast %86 : vector<4xf32> to vector<1x4xf32>
    %88 = arith.mulf %82, %82 : vector<128x4xf32>
    %cst_37 = arith.constant dense<0.000000e+00> : vector<4xf32>
    %89 = vector.multi_reduction <add>, %88, %cst_37 [0] : vector<128x4xf32> to vector<4xf32>
    %90 = vector.shape_cast %89 : vector<4xf32> to vector<1x4xf32>
    %91 = tpu.concatenate %87, %90 in 1 : vector<1x4xf32>, vector<1x4xf32> -> vector<1x8xf32>
    %92 = vector.shape_cast %91 : vector<1x8xf32> to vector<1x1x1x8xf32>
    %c0_38 = arith.constant 0 : index
    %c0_39 = arith.constant 0 : index
    %c0_40 = arith.constant 0 : index
    %c0_41 = arith.constant 0 : index
    %93 = vector.load %arg11[%c0_38, %c0_39, %c0_40, %c0_41] : memref<1x1x1x8xf32, #tpu.memory_space<vmem>>, vector<1x1x1x8xf32>
    tpu.vector_store %arg11[%c0_38, %c0_39, %c0_40, %c0_41], %92 {strides = array<i32>} : memref<1x1x1x8xf32, #tpu.memory_space<vmem>>, vector<1x1x1x8xf32>,
    return
  }
  func.func @transform_0(%arg0: i32, %arg1: i32) -> (i32, i32, i32, i32) {
    %c8_i32 = arith.constant 8 : i32
    %0 = arith.muli %arg1, %c8_i32 : i32
    %c1_i32 = arith.constant 1 : i32
    %1 = arith.subi %0, %c1_i32 : i32
    %c0_i32 = arith.constant 0 : i32
    %2 = arith.maxsi %1, %c0_i32 : i32
    %c0_i32_0 = arith.constant 0 : i32
    %c0_i32_1 = arith.constant 0 : i32
    %c0_i32_2 = arith.constant 0 : i32
    return %arg0, %2, %c0_i32_0, %c0_i32_1 : i32, i32, i32, i32
  }
  func.func @transform_1(%arg0: i32, %arg1: i32) -> (i32, i32, i32, i32) {
    %c0_i32 = arith.constant 0 : i32
    %c0_i32_0 = arith.constant 0 : i32
    %c0_i32_1 = arith.constant 0 : i32
    return %arg0, %arg1, %c0_i32, %c0_i32_0 : i32, i32, i32, i32
  }
  func.func @transform_2(%arg0: i32, %arg1: i32) -> (i32, i32, i32, i32) {
    %c1_i32 = arith.constant 1 : i32
    %0 = arith.addi %arg1, %c1_i32 : i32
    %c8_i32 = arith.constant 8 : i32
    %1 = arith.muli %0, %c8_i32 : i32
    %c15_i32 = arith.constant 15 : i32
    %2 = arith.minsi %1, %c15_i32 : i32
    %c0_i32 = arith.constant 0 : i32
    %c0_i32_0 = arith.constant 0 : i32
    %c0_i32_1 = arith.constant 0 : i32
    return %arg0, %2, %c0_i32, %c0_i32_0 : i32, i32, i32, i32
  }
  func.func @transform_3(%arg0: i32, %arg1: i32) -> (i32, i32) {
    %c0_i32 = arith.constant 0 : i32
    %c0_i32_0 = arith.constant 0 : i32
    %c0_i32_1 = arith.constant 0 : i32
    return %c0_i32, %c0_i32_0 : i32, i32
  }
  func.func @transform_4(%arg0: i32, %arg1: i32) -> (i32, i32) {
    %c0_i32 = arith.constant 0 : i32
    %c0_i32_0 = arith.constant 0 : i32
    %c0_i32_1 = arith.constant 0 : i32
    return %c0_i32, %c0_i32_0 : i32, i32
  }
  func.func @transform_5(%arg0: i32, %arg1: i32) -> (i32, i32) {
    %c0_i32 = arith.constant 0 : i32
    %c0_i32_0 = arith.constant 0 : i32
    %c0_i32_1 = arith.constant 0 : i32
    return %c0_i32, %c0_i32_0 : i32, i32
  }
  func.func @transform_6(%arg0: i32, %arg1: i32) -> (i32, i32) {
    %c0_i32 = arith.constant 0 : i32
    %c0_i32_0 = arith.constant 0 : i32
    %c0_i32_1 = arith.constant 0 : i32
    return %c0_i32, %c0_i32_0 : i32, i32
  }
  func.func @transform_7(%arg0: i32, %arg1: i32) -> (i32, i32) {
    %c0_i32 = arith.constant 0 : i32
    %c0_i32_0 = arith.constant 0 : i32
    %c0_i32_1 = arith.constant 0 : i32
    return %c0_i32, %c0_i32_0 : i32, i32
  }
  func.func @transform_8(%arg0: i32, %arg1: i32) -> (i32, i32, i32, i32) {
    %c0_i32 = arith.constant 0 : i32
    %c0_i32_0 = arith.constant 0 : i32
    %c0_i32_1 = arith.constant 0 : i32
    return %arg0, %arg1, %c0_i32, %c0_i32_0 : i32, i32, i32, i32
  }
  func.func @transform_9(%arg0: i32, %arg1: i32) -> (i32, i32, i32, i32) {
    %c0_i32 = arith.constant 0 : i32
    %c0_i32_0 = arith.constant 0 : i32
    %c0_i32_1 = arith.constant 0 : i32
    return %arg0, %arg1, %c0_i32, %c0_i32_0 : i32, i32, i32, i32
  }
}

module attributes {stable_mosaic.version = 11 : i64} {
  func.func @_bn_residual_kernel(%arg0: i32, %arg1: i32, %arg2: memref<1x16x64xf32, #tpu.memory_space<vmem>>, %arg3: memref<1x16x64xbf16, #tpu.memory_space<vmem>>, %arg4: memref<1x64xf32, #tpu.memory_space<vmem>>, %arg5: memref<1x64xf32, #tpu.memory_space<vmem>>, %arg6: memref<1x16x64xf32, #tpu.memory_space<vmem>>) attributes {dimension_semantics = [#tpu.dimension_semantics<parallel>, #tpu.dimension_semantics<parallel>], iteration_bounds = array<i64: 2, 1>, scalar_prefetch = 0 : i64, scratch_operands = 0 : i64, tpu.core_type = #tpu.core_type<tc>, window_params = [{transform_indices = @transform_0, window_bounds = array<i64: 1, 16, 64>}, {transform_indices = @transform_1, window_bounds = array<i64: 1, 16, 64>}, {pipeline_mode = #tpu.pipeline_mode<synchronous>, transform_indices = @transform_2, window_bounds = array<i64: 1, 64>}, {pipeline_mode = #tpu.pipeline_mode<synchronous>, transform_indices = @transform_3, window_bounds = array<i64: 1, 64>}, {transform_indices = @transform_4, window_bounds = array<i64: 1, 16, 64>}]} {
    %c0 = arith.constant 0 : index
    %c0_0 = arith.constant 0 : index
    %c0_1 = arith.constant 0 : index
    %0 = vector.load %arg2[%c0, %c0_0, %c0_1] : memref<1x16x64xf32, #tpu.memory_space<vmem>>, vector<1x16x64xf32>
    %c0_2 = arith.constant 0 : index
    %c0_3 = arith.constant 0 : index
    %c0_4 = arith.constant 0 : index
    %1 = vector.load %arg3[%c0_2, %c0_3, %c0_4] : memref<1x16x64xbf16, #tpu.memory_space<vmem>>, vector<1x16x64xbf16>
    %2 = arith.extf %1 : vector<1x16x64xbf16> to vector<1x16x64xf32>
    %c0_5 = arith.constant 0 : index
    %c0_6 = arith.constant 0 : index
    %3 = vector.load %arg4[%c0_5, %c0_6] : memref<1x64xf32, #tpu.memory_space<vmem>>, vector<1x64xf32>
    %4 = vector.shape_cast %3 : vector<1x64xf32> to vector<1x1x64xf32>
    %5 = vector.broadcast %4 : vector<1x1x64xf32> to vector<1x16x64xf32>
    %6 = arith.mulf %2, %5 : vector<1x16x64xf32>
    %7 = arith.addf %0, %6 : vector<1x16x64xf32>
    %c0_7 = arith.constant 0 : index
    %c0_8 = arith.constant 0 : index
    %8 = vector.load %arg5[%c0_7, %c0_8] : memref<1x64xf32, #tpu.memory_space<vmem>>, vector<1x64xf32>
    %9 = vector.shape_cast %8 : vector<1x64xf32> to vector<1x1x64xf32>
    %10 = vector.broadcast %9 : vector<1x1x64xf32> to vector<1x16x64xf32>
    %11 = arith.addf %7, %10 : vector<1x16x64xf32>
    %c0_9 = arith.constant 0 : index
    %c0_10 = arith.constant 0 : index
    %c0_11 = arith.constant 0 : index
    %12 = vector.load %arg6[%c0_9, %c0_10, %c0_11] : memref<1x16x64xf32, #tpu.memory_space<vmem>>, vector<1x16x64xf32>
    tpu.vector_store %arg6[%c0_9, %c0_10, %c0_11], %11 {strides = array<i32>} : memref<1x16x64xf32, #tpu.memory_space<vmem>>, vector<1x16x64xf32>,
    return
  }
  func.func @transform_0(%arg0: i32, %arg1: i32) -> (i32, i32, i32) {
    %c0_i32 = arith.constant 0 : i32
    %c0_i32_0 = arith.constant 0 : i32
    return %arg0, %arg1, %c0_i32 : i32, i32, i32
  }
  func.func @transform_1(%arg0: i32, %arg1: i32) -> (i32, i32, i32) {
    %c0_i32 = arith.constant 0 : i32
    %c0_i32_0 = arith.constant 0 : i32
    return %arg0, %arg1, %c0_i32 : i32, i32, i32
  }
  func.func @transform_2(%arg0: i32, %arg1: i32) -> (i32, i32) {
    %c0_i32 = arith.constant 0 : i32
    %c0_i32_0 = arith.constant 0 : i32
    %c0_i32_1 = arith.constant 0 : i32
    return %c0_i32, %c0_i32_0 : i32, i32
  }
  func.func @transform_3(%arg0: i32, %arg1: i32) -> (i32, i32) {
    %c0_i32 = arith.constant 0 : i32
    %c0_i32_0 = arith.constant 0 : i32
    %c0_i32_1 = arith.constant 0 : i32
    return %c0_i32, %c0_i32_0 : i32, i32
  }
  func.func @transform_4(%arg0: i32, %arg1: i32) -> (i32, i32, i32) {
    %c0_i32 = arith.constant 0 : i32
    %c0_i32_0 = arith.constant 0 : i32
    return %arg0, %arg1, %c0_i32 : i32, i32, i32
  }
}

</mosaic_0001>

<bundles_post_ra>
// kernel: _forward.5
= control target key start
LH: loop header
LB: loop body
LE: loop exit
PB: predicated region body
PF: predicated region fallthrough
CT: control target
= control target key end

     0   :  { %s502_s15 = smov 0   ;;  %s504_s16 = smov 0   ;;  %s544_s0 = inlined_call_operand.vmem [shape: f32[2,16,64], index: 0, kind: input, shape index: {}]   ;;  %s545_s1 = inlined_call_operand.vmem [shape: bf16[2,16,64], index: 1, kind: input, shape index: {}]   ;;  %s546_s2 = inlined_call_operand.vmem [shape: f32[1,64], index: 2, kind: input, shape index: {}]   ;;  %s547_s3 = inlined_call_operand.vmem [shape: f32[1,64], index: 3, kind: input, shape index: {}]   ;;  %s548_s4 = inlined_call_operand.vmem [shape: f32[2,16,64], index: 4, kind: output, shape index: {}]  }
   0x1   :  { %s506_s17 = smov 0  }
   0x2 LB: > { %s26_s18 = sadd.s32 1, %s471_s16  ;;  %p411_p0 = scmp.ge.s32.totalorder %s475_s17, 1  ;;  %s475_s17 = sphi %s506_s17, %s14_s17   ;;  %s471_s16 = sphi %s504_s16, %s550_s16   ;;  %s467_s15 = sphi %s502_s15, %s549_s15  }
   0x3   : > { %p28_p1 = scmp.ge.s32.totalorder %s26_s18, 2  ;;  %p200_p2 = scmp.lt.s32.totalorder %s475_s17, 3 }
   0x5   : > { %s552_s18 = smov (%p28_p1, %s26_s18), 0  ;;  %p201_p3 = pnand %p411_p0, %p200_p2 }
   0x6   : > { %p244_p4 = scmp.lt.s32.totalorder (!%p201_p3), %s467_s15, 1  ;;  %v418_v1 = vld [vmem:[%s546_s2] ss:$0 sm:$0xff] (!%p201_p3)  ;;  %vm299_vm0 = vcmask (!%p201_p3), 523264  }
   0x7   : > { %204 = sbr.rel (%p201_p3) target bundleno = 27 (0x1b), region = 36  ;;  %v419_v8 = vld [vmem:[%s547_s3] ss:$0 sm:$0xff] (!%p201_p3) }
   0xe   : > { %s554_s15 = smov (!%p244_p4, %s467_s15), 1 }
   0xf   : > { %s422_s19 = sshll.u32 %s554_s15, 4  ;;  %s423_s20 = sshll.u32 %s554_s15, 3 }
  0x10   : > { %s251_s23 = scalar_lea.vmem %s544_s0, %s422_s19  ;;  %s261_s26 = scalar_lea.vmem %s545_s1, %s423_s20 }
  0x11   : > { %v426_v0 = vld [vmem:[%s261_s26] sm:$0xff]   ;;  %v274_v5 = vld [vmem:[%s251_s23 + $0x8] sm:$0xff]  ;;  %s271_s7 = scalar_lea.vmem %s548_s4, %s422_s19 }
  0x12   : > { %v427_v2 = vunpack.c.l.bf16 %v426_v0  ;;  %v428_v3 = vunpack.c.h.bf16 %v426_v0  ;;  %v273_v4 = vld [vmem:[%s251_s23] sm:$0xff] }
  0x14   : > { %v286_v6 = vmul.f32 %v427_v2, %v418_v1  ;;  %v287_v7 = vmul.f32 %v428_v3, %v418_v1 }
  0x16   : > { %v288_v9 = vadd.f32 %v286_v6, %v273_v4  ;;  %v289_v10 = vadd.f32 %v287_v7, %v274_v5 }
  0x18   : > { %v297_v11 = vadd.f32 %v419_v8, %v288_v9  ;;  %v298_v12 = vadd.f32 %v419_v8, %v289_v10 }
  0x1a   : > { %300 = vst.msk [vmem:[%s271_s7] sm:$0xff] %vm299_vm0, %v297_v11  ;;  %301 = vst.msk [vmem:[%s271_s7 + $0x8] sm:$0xff] %vm299_vm0, %v298_v12 }
  0x1b PF: > { %s14_s17 = sadd.s32 1, %s475_s17   ;;  %s549_s15 = smov %s471_s16 }
  0x1c   : > { %p11_p5 = scmp.ge.s32.totalorder %s14_s17, 4   ;;  %s550_s16 = smov %s552_s18 }
  0x1e   :  { %13 = sbr.rel (!%p11_p5) target bundleno = 2 (0x2), region = 69 }

// kernel: _forward.4
= control target key start
LH: loop header
LB: loop body
LE: loop exit
PB: predicated region body
PF: predicated region fallthrough
CT: control target
= control target key end

     0   :  { %s2223_s11 = smov 0   ;;  %s2225_s12 = smov 0   ;;  %s2749_s0 = inlined_call_operand.vmem [shape: bf16[2,16,16,4], index: 0, kind: input, shape index: {}, may-alias: {0,1,2}]   ;;  %s2750_s1 = inlined_call_operand.vmem [shape: bf16[2,16,16,4], index: 1, kind: input, shape index: {}, may-alias: {0,1,2}]   ;;  %s2751_s2 = inlined_call_operand.vmem [shape: bf16[2,16,16,4], index: 2, kind: input, shape index: {}, may-alias: {0,1,2}]   ;;  %s2752_s3 = inlined_call_operand.vmem [shape: f32[1,4], index: 3, kind: input, shape index: {}]   ;;  %s2753_s4 = inlined_call_operand.vmem [shape: f32[1,4], index: 4, kind: input, shape index: {}]   ;;  %s2754_s5 = inlined_call_operand.<no memory space> [shape: f32[1,1], index: 5, kind: input, shape index: {}]   ;;  %s2755_s6 = inlined_call_operand.vmem [shape: bf16[36,4], index: 6, kind: input, shape index: {}]   ;;  %s2756_s7 = inlined_call_operand.vmem [shape: f32[1,4], index: 7, kind: input, shape index: {}]   ;;  %s2757_s8 = inlined_call_operand.vmem [shape: bf16[2,16,16,4], index: 8, kind: output, shape index: {0}]   ;;  %s2758_s9 = inlined_call_operand.vmem [shape: f32[2,2,1,8], index: 9, kind: output, shape index: {1}]  }
   0x1   :  { %15 = sst [smem:[#allocation2]] %s2754_s5  ;;  %s2227_s13 = smov 0  }
   0x2   :  { %s2229_s14 = smov 0   ;;  %s2231_s15 = smov 0  }
   0x3 LB: > { %s30_s5 = sadd.s32 1, %s2158_s13  ;;  %s33_s16 = sadd.s32 1, %s2162_s14  ;;  %s2166_s15 = sphi %s2231_s15, %s21_s15   ;;  %s2162_s14 = sphi %s2229_s14, %s2767_s14   ;;  %s2158_s13 = sphi %s2227_s13, %s2766_s13   ;;  %s2154_s12 = sphi %s2225_s12, %s2765_s12   ;;  %s2150_s11 = sphi %s2223_s11, %s2764_s11  }
   0x4   : > { %p31_p0 = scmp.ge.s32.totalorder %s30_s5, 2  ;;  %p1818_p1 = scmp.ge.s32.totalorder %s2166_s15, 1 }
   0x5   : > { %p379_p2 = scmp.lt.s32.totalorder %s2166_s15, 5 }
   0x6   : > { %s2769_s5 = smov (%p31_p0, %s30_s5), 0  ;;  %s2771_s16 = smov (!%p31_p0, %s33_s16), %s2162_s14 }
   0x7   : > { %p380_p3 = pnand %p1818_p1, %p379_p2  ;;  %p35_p4 = scmp.ge.s32.totalorder %s2771_s16, 2 }
   0x8   : > { %s2256_s17 = sshll.u32 (!%p380_p3), %s2150_s11, 3  ;;  %p462_p5 = scmp.lt.s32.totalorder (!%p380_p3), %s2154_s12, 1  ;;  %v2282_v0 = vld [vmem:[%s2752_s3] ss:$0 sm:$0xff] (!%p380_p3)  ;;  %vm788_vm0 = vcmask (!%p380_p3), 1040384   ;;  %vm940_vm10 = vcmask (!%p380_p3), 1046528  }
   0x9   : > { %s2773_s16 = smov (%p35_p4, %s2771_s16), 0  ;;  %383 = sbr.rel (%p380_p3) target bundleno = 589 (0x24d), region = 52 }
   0xa   : > { %p478_p6 = scmp.lt.s32.totalorder (!%p380_p3), %s2256_s17, 15  ;;  %s2259_s18 = sld [smem:[#allocation2]] (!%p380_p3)  ;;  %v2292_v9 = vld [vmem:[%s2753_s4] ss:$0 sm:$0xff] (!%p380_p3)  ;;  %vm789_vm1 = vsmask.f32 (!%p380_p3), 256 }
   0xb   : > { %s1820_s22 = sadd.s32 (!%p380_p3), 4294967295, %s2256_s17  ;;  %p688_p9 = scmp.gt.s32.totalorder (!%p380_p3), %s2150_s11, 0  ;;  %vm811_vm9 = vsmask.f32 (!%p380_p3), 7424  ;;  %vm2341_vm11 = vmand (!%p380_p3), %vm788_vm0, %vm789_vm1 }
   0xc   : > { %p460_p7 = scmp.gt.s32.totalorder (!%p380_p3), %s1820_s22, 0  ;;  %p1821_p8 = scmp.lt.s32.totalorder (!%p380_p3), %s1820_s22, 15 }
   0xd   : > { %p516_p11 = scmp.lt.s32.totalorder (!%p380_p3), %s2150_s11, 1 }
  0x10   : > { %s2775_s12 = smov (!%p462_p5, %s2154_s12), 1  ;;  %v2302_v18 = vstv %s2259_s18  ;;  %s2783_s11 = smov (!%p516_p11, %s2150_s11), 1 }
  0x11   : > { %s479_s19 = scalar_select %p478_p6, %s2256_s17, 15 }
  0x12   : > { %s2265_s20 = sshll.u32 %s2775_s12, 5 }
  0x13   : > { %s1830_s21 = sshll.u32 %s479_s19, 1  ;;  %s2168_s19 = smov 4  }
  0x14   : > { %s2269_s23 = sadd.s32 %s1830_s21, %s2265_s20 }
  0x15   : > { %s1832_s24 = sshll.u32 %s2269_s23, 2  ;;  %s1844_s23 = sshll.u32 %s2775_s12, 1 }
  0x16   : > { %s2277_s27 = scalar_lea.vmem %s2750_s1, %s1832_s24 }
  0x17   : > { %v1957_v1 = vld [vmem:[%s2277_s27 + $0x8] sm:$0xff]   ;;  %v1918_v2 = vld [vmem:[%s2277_s27] sm:$0xff]   ;;  %s461_s30 = scalar_select %p460_p7, %s1820_s22, 0  ;;  %v1959_v3 = vld [vmem:[%s2277_s27 + $0x18] sm:$0xff]  }
  0x18   : > { %v1923_v4 = vunpack.c.l.bf16 %v1957_v1  ;;  %v1924_v5 = vunpack.c.h.bf16 %v1957_v1  ;;  %v1919_v6 = vunpack.c.l.bf16 %v1918_v2  ;;  %v1920_v7 = vunpack.c.h.bf16 %v1918_v2  ;;  %v1958_v8 = vld [vmem:[%s2277_s27 + $0x10] sm:$0xff]   ;;  %s2299_s21 = scalar_select %p688_p9, 1, 0 }
  0x19   : > { %s2777_s30 = smov (!%p1821_p8, %s461_s30), 15  ;;  %v1931_v10 = vunpack.c.l.bf16 %v1959_v3  ;;  %v1932_v11 = vunpack.c.h.bf16 %v1959_v3  ;;  %v1927_v12 = vunpack.c.l.bf16 %v1958_v8  ;;  %v1928_v13 = vunpack.c.h.bf16 %v1958_v8 }
  0x1a   : > { %v565_v14 = vmul.f32 %v1923_v4, %v2282_v0  ;;  %v566_v15 = vmul.f32 %v1924_v5, %v2282_v0  ;;  %v563_v16 = vmul.f32 %v1919_v6, %v2282_v0  ;;  %v564_v17 = vmul.f32 %v1920_v7, %v2282_v0  ;;  %s1826_s22 = sshll.u32 %s2777_s30, 1  ;;  %s1900_s30 = sadd.s32 8, %s2256_s17 }
  0x1b   : > { %v569_v19 = vmul.f32 %v1931_v10, %v2282_v0  ;;  %v570_v20 = vmul.f32 %v1932_v11, %v2282_v0  ;;  %v567_v21 = vmul.f32 %v1927_v12, %v2282_v0  ;;  %s468_s25 = sadd.s32 %s2265_s20, %s1826_s22  ;;  %v690_v26 = vstv %s2299_s21  ;;  %p2383_p10 = scmp.lt.s32.totalorder %s1900_s30, 15 }
  0x1c   : > { %v587_v22 = vadd.f32 %v2292_v9, %v565_v14  ;;  %v588_v23 = vadd.f32 %v2292_v9, %v566_v15  ;;  %v585_v24 = vadd.f32 %v2292_v9, %v563_v16  ;;  %v586_v25 = vadd.f32 %v2292_v9, %v564_v17  ;;  %s1828_s18 = sshll.u32 %s468_s25, 2  ;;  %s2169_s17 = smov 8  }
  0x1d   : > { %v591_v27 = vadd.f32 %v2292_v9, %v569_v19  ;;  %v592_v28 = vadd.f32 %v2292_v9, %v570_v20  ;;  %v568_v29 = vmul.f32 %v1928_v13, %v2282_v0  ;;  %s470_s29 = scalar_lea.vmem %s2749_s0, %s1828_s18  ;;  %v2324_v42 = vadd.f32 %v2292_v9, %v567_v21  ;;  %s2779_s30 = smov (!%p2383_p10, %s1900_s30), 15 }
  0x1e   : > { %vm603_vm2 = vcmp.gt.f32.partialorder %v587_v22, 0.0  ;;  %vm604_vm3 = vcmp.gt.f32.partialorder %v588_v23, 0.0  ;;  %v620_v30 = vmul.f32 %v2302_v18, %v587_v22  ;;  %v621_v31 = vmul.f32 %v2302_v18, %v588_v23  ;;  %v1950_v34 = vld [vmem:[%s470_s29] sm:$0xff]   ;;  %s2781_s30 = smov (!%p2383_p10, %s2779_s30), 15 }
  0x1f   : > { %vm601_vm4 = vcmp.gt.f32.partialorder %v585_v24, 0.0  ;;  %vm602_vm5 = vcmp.gt.f32.partialorder %v586_v25, 0.0  ;;  %v618_v32 = vmul.f32 %v2302_v18, %v585_v24  ;;  %v619_v33 = vmul.f32 %v2302_v18, %v586_v25  ;;  %s2441_s21 = sshll.u32 %s2781_s30, 1 }
  0x20   : > { %v636_v35 = vsel %vm603_vm2, %v587_v22, %v620_v30  ;;  %v637_v36 = vsel %vm604_vm3, %v588_v23, %v621_v31  ;;  %v1951_v37 = vunpack.c.l.bf16 %v1950_v34  ;;  %v1952_v38 = vunpack.c.h.bf16 %v1950_v34  ;;  %v1961_v31 = vld [vmem:[%s2277_s27 + $0x28] sm:$0xff]   ;;  %s496_s22 = sadd.s32 %s2441_s21, %s2265_s20 }
  0x21   : > { %v651_v39 = vpack.c.bf16 %v637_v36, %v636_v35  ;;  %v634_v40 = vsel %vm601_vm4, %v585_v24, %v618_v32  ;;  %v635_v41 = vsel %vm602_vm5, %v586_v25, %v619_v33  ;;  %vm2328_vm6 = vcmp.eq.s32.totalorder %v690_v26, 1  ;;  %s1839_s20 = sshll.u32 %s496_s22, 2 }
  0x22   : > { %v650_v43 = vpack.c.bf16 %v635_v41, %v634_v40  ;;  %v662_v44 = vmul.f32 %v1951_v37, %v2282_v0  ;;  %v663_v45 = vmul.f32 %v1952_v38, %v2282_v0  ;;  %vm607_vm7 = vcmp.gt.f32.partialorder %v591_v27, 0.0  ;;  %s498_s18 = scalar_lea.vmem %s2751_s2, %s1839_s20 }
  0x23   : > { %v713_v47 = vshrl.u32 %v651_v39, 16  ;;  %v716_v48 = vshll.u32 %v651_v39, 16  ;;  %vm608_vm8 = vcmp.gt.f32.partialorder %v592_v28, 0.0  ;;  %v624_v49 = vmul.f32 %v2302_v18, %v591_v27  ;;  %s2509_s26 = scalar_select %p516_p11, 1, 0 }
  0x24   : > { %v706_v50 = vshrl.u32 %v650_v43, 16  ;;  %v709_v51 = vshll.u32 %v650_v43, 16  ;;  %v664_v52 = vadd.f32 %v2292_v9, %v662_v44  ;;  %v665_v53 = vadd.f32 %v2292_v9, %v663_v45 }
  0x25   : > { %v715_v54 = vrot.slane %v713_v47, 7  ;;  %v625_v55 = vmul.f32 %v2302_v18, %v592_v28  ;;  %v640_v56 = vsel %vm607_vm7, %v591_v27, %v624_v49  ;;  %v2337_v57 = vadd.f32 %v2292_v9, %v568_v29 }
  0x26   : > { %v708_v59 = vrot.slane %v706_v50, 7  ;;  %vm666_vm12 = vcmp.gt.f32.partialorder %v664_v52, 0.0  ;;  %vm667_vm13 = vcmp.gt.f32.partialorder %v665_v53, 0.0  ;;  %v668_v60 = vmul.f32 %v664_v52, %v2302_v18 }
  0x27   : > { %v718_v61 = vor.u32 %v716_v48, %v715_v54  ;;  %v803_v62 = vsel %vm2341_vm11, %v715_v54, 0  ;;  %v669_v63 = vmul.f32 %v665_v53, %v2302_v18  ;;  %v641_v1 = vsel %vm608_vm8, %v592_v28, %v625_v55 }
  0x28   : > { %v844_v2 = vshll.u32 %v803_v62, 16  ;;  %v711_v3 = vor.u32 %v709_v51, %v708_v59  ;;  %v802_v4 = vsel %vm2341_vm11, %v708_v59, 0  ;;  %v670_v5 = vsel %vm666_vm12, %v664_v52, %v668_v60 }
  0x29   : > { %v2354_v6 = vsel %vm2341_vm11, 0, %v718_v61  ;;  %v832_v7 = vshll.u32 %v802_v4, 16  ;;  %v671_v8 = vsel %vm667_vm13, %v665_v53, %v669_v63  ;;  %v948_v10 = vrot.slane %v803_v62, 1 }
  0x2a   : > { %v837_v11 = vshrl.u32 %v2354_v6, 16  ;;  %v839_v12 = vshll.u32 %v2354_v6, 16  ;;  %v846_v13 = vrot.slane %v844_v2, 1  ;;  %v2360_v14 = vsel %vm2341_vm11, 0, %v711_v3 }
  0x2b   : > { %v825_v15 = vshrl.u32 %v2360_v14, 16  ;;  %v827_v16 = vshll.u32 %v2360_v14, 16  ;;  %v834_v17 = vrot.slane %v832_v7, 1  ;;  %v672_v19 = vpack.c.bf16 %v671_v8, %v670_v5 }
  0x2c   : > { %v841_v20 = vrot.slane %v839_v12, 1  ;;  %v947_v21 = vrot.slane %v2354_v6, 1  ;;  %v944_v22 = vrot.slane %v2360_v14, 1  ;;  %v945_v23 = vrot.slane %v802_v4, 1 }
  0x2d   : > { %v829_v24 = vrot.slane %v827_v16, 1  ;;  %v692_v25 = vsel %vm2328_vm6, %v672_v19, 0  ;;  %v653_v26 = vpack.c.bf16 %v641_v1, %v640_v56  ;;  %vm605_vm14 = vcmp.gt.f32.partialorder %v2324_v42, 0.0  ;;  %v1960_v1 = vld [vmem:[%s2277_s27 + $0x20] sm:$0xff]  }
  0x2e   : > { %v842_v27 = vor.u32 %v841_v20, %v837_v11  ;;  %v699_v28 = vshrl.u32 %v692_v25, 16  ;;  %v702_v29 = vshll.u32 %v692_v25, 16  ;;  %v2371_v30 = vsel %vm940_vm10, %v947_v21, %v948_v10 }
  0x2f   : > { %v830_v32 = vor.u32 %v829_v24, %v825_v15  ;;  %v2375_v33 = vsel %vm940_vm10, %v944_v22, %v945_v23  ;;  %v727_v34 = vshrl.u32 %v653_v26, 16  ;;  %v730_v35 = vshll.u32 %v653_v26, 16 }
  0x30   : > { %v847_v36 = vsel %vm811_vm9, %v842_v27, %v846_v13  ;;  %v701_v37 = vrot.slane %v699_v28, 7  ;;  %vm606_vm15 = vcmp.gt.f32.partialorder %v2337_v57, 0.0  ;;  %v622_v38 = vmul.f32 %v2302_v18, %v2324_v42 }
  0x31   : > { %912 = vrot.lane.b32.xlu1 %v847_v36, %s2168_s19  ;;  %v835_v39 = vsel %vm811_vm9, %v830_v32, %v834_v17  ;;  %v729_v40 = vrot.slane %v727_v34, 7  ;;  %v623_v41 = vmul.f32 %v2302_v18, %v2337_v57  ;;  %v1939_v43 = vunpack.c.l.bf16 %v1961_v31  ;;  %v1962_v34 = vld [vmem:[%s2277_s27 + $0x30] sm:$0xff]  }
  0x32   : > { %910 = vrot.lane.b32.xlu0 %v835_v39, %s2168_s19  ;;  %v704_v44 = vor.u32 %v702_v29, %v701_v37  ;;  %v801_v45 = vsel %vm2341_vm11, %v701_v37, 0  ;;  %v638_v46 = vsel %vm605_vm14, %v2324_v42, %v622_v38  ;;  %v1940_v47 = vunpack.c.h.bf16 %v1961_v31  ;;  %v1963_v38 = vld [vmem:[%s2277_s27 + $0x38] sm:$0xff]  }
  0x33   : > { %v942_v48 = vrot.slane %v801_v45, 1  ;;  %v820_v49 = vshll.u32 %v801_v45, 16  ;;  %v732_v50 = vor.u32 %v730_v35, %v729_v40  ;;  %v805_v51 = vsel %vm2341_vm11, %v729_v40, 0 }
  0x34   : > { %v2401_v52 = vsel %vm2341_vm11, 0, %v704_v44  ;;  %v868_v53 = vshll.u32 %v805_v51, 16  ;;  %v639_v54 = vsel %vm606_vm15, %v2337_v57, %v623_v41  ;;  %v954_v55 = vrot.slane %v805_v51, 1 }
  0x35   : > { %v941_v42 = vrot.slane %v2401_v52, 1  ;;  %v813_v56 = vshrl.u32 %v2401_v52, 16  ;;  %v815_v59 = vshll.u32 %v2401_v52, 16  ;;  %v822_v60 = vrot.slane %v820_v49, 1 }
  0x36   : > { %v2417_v61 = vsel %vm2341_vm11, 0, %v732_v50  ;;  %v870_v62 = vrot.slane %v868_v53, 1  ;;  %v652_v57 = vpack.c.bf16 %v639_v54, %v638_v46  ;;  %v573_v63 = vmul.f32 %v1939_v43, %v2282_v0 }
  0x37   : > { %v943_v2 = vsel %vm940_vm10, %v941_v42, %v942_v48  ;;  %v817_v3 = vrot.slane %v815_v59, 1  ;;  %v861_v4 = vshrl.u32 %v2417_v61, 16  ;;  %v863_v5 = vshll.u32 %v2417_v61, 16 }
  0x38   : > { %965 = vrot.lane.b32.xlu1 %v943_v2, %s2169_s17  ;;  %v720_v7 = vshrl.u32 %v652_v57, 16  ;;  %v723_v8 = vshll.u32 %v652_v57, 16  ;;  %v953_v10 = vrot.slane %v2417_v61, 1  ;;  %v574_v11 = vmul.f32 %v1940_v47, %v2282_v0 }
  0x39   : > { %v818_v12 = vor.u32 %v817_v3, %v813_v56  ;;  %v865_v13 = vrot.slane %v863_v5, 1  ;;  %v595_v15 = vadd.f32 %v2292_v9, %v573_v63  ;;  %v1935_v16 = vunpack.c.l.bf16 %v1960_v1 }
  0x3a   : > { %v722_v17 = vrot.slane %v720_v7, 7  ;;  %v955_v19 = vsel %vm940_vm10, %v953_v10, %v954_v55  ;;  %v596_v20 = vadd.f32 %v2292_v9, %v574_v11  ;;  %v1936_v21 = vunpack.c.h.bf16 %v1960_v1 }
  0x3b   : > { %v823_v22 = vsel %vm811_vm9, %v818_v12, %v822_v60  ;;  %v866_v23 = vor.u32 %v865_v13, %v861_v4  ;;  %vm611_vm0 = vcmp.gt.f32.partialorder %v595_v15, 0.0  ;;  %v628_v24 = vmul.f32 %v2302_v18, %v595_v15 }
  0x3c   : > { %908 = vrot.lane.b32.xlu0 %v823_v22, %s2168_s19  ;;  %969 = vrot.lane.b32.xlu1 %v2371_v30, %s2169_s17  ;;  %v725_v25 = vor.u32 %v723_v8, %v722_v17  ;;  %v804_v26 = vsel %vm2341_vm11, %v722_v17, 0  ;;  %vm612_vm1 = vcmp.gt.f32.partialorder %v596_v20, 0.0  ;;  %v629_v27 = vmul.f32 %v2302_v18, %v596_v20  ;;  %v1954_v17 = vld [vmem:[%s498_s18] sm:$0xff]   ;;  %s2644_s18 = scalar_lea.vmem %s2757_s8, %s1832_s24  ;;  %s519_s24 = sadd.s32 %s1844_s23, %s2783_s11 }
  0x3d   : > { %v871_v28 = vsel %vm811_vm9, %v866_v23, %v870_v62  ;;  %v856_v29 = vshll.u32 %v804_v26, 16  ;;  %v951_v31 = vrot.slane %v804_v26, 1  ;;  %v644_v32 = vsel %vm611_vm0, %v595_v15, %v628_v24  ;;  %s520_s29 = scalar_lea.vmem %s2758_s9, %s519_s24 }
  0x3e   : > { %v2447_v30 = vsel %vm2341_vm11, 0, %v725_v25  ;;  %v645_v35 = vsel %vm612_vm1, %v596_v20, %v629_v27  ;;  %v571_v36 = vmul.f32 %v1935_v16, %v2282_v0  ;;  %v572_v37 = vmul.f32 %v1936_v21, %v2282_v0 }
  0x3f   : > { %v849_v39 = vshrl.u32 %v2447_v30, 16  ;;  %v851_v40 = vshll.u32 %v2447_v30, 16  ;;  %v858_v41 = vrot.slane %v856_v29, 1  ;;  %v950_v43 = vrot.slane %v2447_v30, 1 }
  0x40   : > { %967 = vrot.lane.b32.xlu0 %v2375_v33, %s2169_s17  ;;  %916 = vrot.lane.b32.xlu1 %v871_v28, %s2168_s19  ;;  %v655_v44 = vpack.c.bf16 %v645_v35, %v644_v32  ;;  %v593_v45 = vadd.f32 %v2292_v9, %v571_v36  ;;  %v594_v46 = vadd.f32 %v2292_v9, %v572_v37  ;;  %v1943_v47 = vunpack.c.l.bf16 %v1962_v34 }
  0x41   : > { %v853_v48 = vrot.slane %v851_v40, 1  ;;  %v952_v49 = vsel %vm940_vm10, %v950_v43, %v951_v31  ;;  %v1944_v50 = vunpack.c.h.bf16 %v1962_v34  ;;  %v1947_v51 = vunpack.c.l.bf16 %v1963_v38 }
  0x42   : > { %v741_v53 = vshrl.u32 %v655_v44, 16  ;;  %v744_v54 = vshll.u32 %v655_v44, 16  ;;  %vm609_vm2 = vcmp.gt.f32.partialorder %v593_v45, 0.0  ;;  %vm610_vm3 = vcmp.gt.f32.partialorder %v594_v46, 0.0 }
  0x43   : > { %v854_v55 = vor.u32 %v853_v48, %v849_v39  ;;  %v626_v33 = vmul.f32 %v2302_v18, %v593_v45  ;;  %v627_v42 = vmul.f32 %v2302_v18, %v594_v46  ;;  %v575_v56 = vmul.f32 %v1943_v47, %v2282_v0 }
  0x44   : > { %973 = vrot.lane.b32.xlu1 %v955_v19, %s2169_s17  ;;  %v743_v59 = vrot.slane %v741_v53, 7  ;;  %v576_v60 = vmul.f32 %v1944_v50, %v2282_v0  ;;  %v1948_v62 = vunpack.c.h.bf16 %v1963_v38  ;;  %v577_v57 = vmul.f32 %v1947_v51, %v2282_v0 }
  0x45   : > { %v859_v63 = vsel %vm811_vm9, %v854_v55, %v858_v41  ;;  %v642_v1 = vsel %vm609_vm2, %v593_v45, %v626_v33  ;;  %v643_v2 = vsel %vm610_vm3, %v594_v46, %v627_v42  ;;  %v597_v3 = vadd.f32 %v2292_v9, %v575_v56 }
  0x46   : > { %914 = vrot.lane.b32.xlu0 %v859_v63, %s2168_s19  ;;  %v746_v4 = vor.u32 %v744_v54, %v743_v59  ;;  %v807_v5 = vsel %vm2341_vm11, %v743_v59, 0  ;;  %v654_v7 = vpack.c.bf16 %v643_v2, %v642_v1  ;;  %v598_v8 = vadd.f32 %v2292_v9, %v576_v60  ;;  %v2125_v59 = vld [vmem:[%s2755_s6 + $0x4] sm:$0xfc]  }
  0x47   : > { %v892_v10 = vshll.u32 %v807_v5, 16  ;;  %v960_v11 = vrot.slane %v807_v5, 1  ;;  %vm613_vm4 = vcmp.gt.f32.partialorder %v597_v3, 0.0  ;;  %v630_v12 = vmul.f32 %v2302_v18, %v597_v3 }
  0x48   : > { %v2481_v13 = vsel %vm2341_vm11, 0, %v746_v4  ;;  %v734_v15 = vshrl.u32 %v654_v7, 16  ;;  %v737_v16 = vshll.u32 %v654_v7, 16  ;;  %vm614_vm5 = vcmp.gt.f32.partialorder %v598_v8, 0.0 }
  0x49   : > { %v885_v19 = vshrl.u32 %v2481_v13, 16  ;;  %v887_v20 = vshll.u32 %v2481_v13, 16  ;;  %v894_v21 = vrot.slane %v892_v10, 1  ;;  %v959_v22 = vrot.slane %v2481_v13, 1 }
  0x4a   : > { %971 = vrot.lane.b32.xlu0 %v952_v49, %s2169_s17  ;;  %v736_v23 = vrot.slane %v734_v15, 7  ;;  %v631_v24 = vmul.f32 %v2302_v18, %v598_v8  ;;  %v646_v25 = vsel %vm613_vm4, %v597_v3, %v630_v12  ;;  %v578_v26 = vmul.f32 %v1948_v62, %v2282_v0 }
  0x4b   : > { %v889_v27 = vrot.slane %v887_v20, 1  ;;  %v961_v28 = vsel %vm940_vm10, %v959_v22, %v960_v11  ;;  %v599_v29 = vadd.f32 %v2292_v9, %v577_v57  ;;  %v1955_v31 = vunpack.c.l.bf16 %v1954_v17  ;;  %v2126_v20 = vld [vmem:[%s2755_s6] sm:$0x3f]  }
  0x4c   : > { %v739_v32 = vor.u32 %v737_v16, %v736_v23  ;;  %v806_v34 = vsel %vm2341_vm11, %v736_v23, 0  ;;  %v647_v35 = vsel %vm614_vm5, %v598_v8, %v631_v24  ;;  %v600_v36 = vadd.f32 %v2292_v9, %v578_v26 }
  0x4d   : > { %v890_v37 = vor.u32 %v889_v27, %v885_v19  ;;  %v880_v38 = vshll.u32 %v806_v34, 16  ;;  %v957_v39 = vrot.slane %v806_v34, 1  ;;  %v656_v40 = vpack.c.bf16 %v647_v35, %v646_v25 }
  0x4e   : > { %v2498_v41 = vsel %vm2341_vm11, 0, %v739_v32  ;;  %vm615_vm6 = vcmp.gt.f32.partialorder %v599_v29, 0.0  ;;  %vm616_vm7 = vcmp.gt.f32.partialorder %v600_v36, 0.0  ;;  %v632_v43 = vmul.f32 %v2302_v18, %v599_v29 }
  0x4f   : > { %v895_v44 = vsel %vm811_vm9, %v890_v37, %v894_v21  ;;  %v873_v45 = vshrl.u32 %v2498_v41, 16  ;;  %v875_v46 = vshll.u32 %v2498_v41, 16  ;;  %v882_v47 = vrot.slane %v880_v38, 1 }
  0x50   : > { %920 = vrot.lane.b32.xlu1 %v895_v44, %s2168_s19  ;;  %v956_v48 = vrot.slane %v2498_v41, 1  ;;  %v748_v49 = vshrl.u32 %v656_v40, 16  ;;  %v751_v50 = vshll.u32 %v656_v40, 16  ;;  %v633_v51 = vmul.f32 %v2302_v18, %v600_v36 }
  0x51   : > { %v877_v53 = vrot.slane %v875_v46, 1  ;;  %v648_v54 = vsel %vm615_vm6, %v599_v29, %v632_v43  ;;  %v1956_v55 = vunpack.c.h.bf16 %v1954_v17  ;;  %v677_v33 = vmul.f32 %v1955_v31, %v2282_v0  ;;  %v2127_v31 = vld [vmem:[%s2755_s6 + $0xc] sm:$0x3f]  }
  0x52   : > { %v750_v42 = vrot.slane %v748_v49, 7  ;;  %v649_v56 = vsel %vm616_vm7, %v600_v36, %v633_v51  ;;  %v958_v1 = vsel %vm940_vm10, %v956_v48, %v957_v39  ;;  %v695_v4 = vstv %s2509_s26 }
  0x53   : > { %v878_v60 = vor.u32 %v877_v53, %v873_v45  ;;  %v657_v62 = vpack.c.bf16 %v649_v56, %v648_v54  ;;  %v678_v57 = vmul.f32 %v1956_v55, %v2282_v0  ;;  %v679_v63 = vadd.f32 %v2292_v9, %v677_v33 }
  0x54   : > { %977 = vrot.lane.b32.xlu1 %v961_v28, %s2169_s17  ;;  %v753_v2 = vor.u32 %v751_v50, %v750_v42  ;;  %v808_v3 = vsel %vm2341_vm11, %v750_v42, 0  ;;  %v1049_v15 = vrot.slane %v2125_v59, 2  ;;  %vm1067_vm13 = vcmask 1045504  }
  0x55   : > { %v883_v5 = vsel %vm811_vm9, %v878_v60, %v882_v47  ;;  %v904_v7 = vshll.u32 %v808_v3, 16  ;;  %v963_v8 = vrot.slane %v808_v3, 1  ;;  %v755_v10 = vshrl.u32 %v657_v62, 16  ;;  %2080 = vmatprep.subr.msk.bf16.mxu0 %vm1067_vm13, %v2126_v20 }
  0x56   : > { %918 = vrot.lane.b32.xlu0 %v883_v5, %s2168_s19  ;;  %v2527_v0 = vsel %vm2341_vm11, 0, %v753_v2  ;;  %v758_v11 = vshll.u32 %v657_v62, 16  ;;  %v680_v12 = vadd.f32 %v2292_v9, %v678_v57  ;;  %vm681_vm8 = vcmp.gt.f32.partialorder %v679_v63, 0.0  ;;  %2079 = vmatprep.subr.msk.bf16.mxu1 %vm1067_vm13, %v1049_v15 }
  0x57   : > { %v897_v16 = vshrl.u32 %v2527_v0, 16  ;;  %v899_v17 = vshll.u32 %v2527_v0, 16  ;;  %v962_v19 = vrot.slane %v2527_v0, 1  ;;  %v757_v21 = vrot.slane %v755_v10, 7 }
  0x58   : > { %vm682_vm12 = vcmp.gt.f32.partialorder %v680_v12, 0.0  ;;  %v683_v22 = vmul.f32 %v679_v63, %v2302_v18  ;;  %v684_v23 = vmul.f32 %v680_v12, %v2302_v18  ;;  %v906_v9 = vrot.slane %v904_v7, 1 }
  0x59   : > { %v901_v24 = vrot.slane %v899_v17, 1  ;;  %v964_v25 = vsel %vm940_vm10, %v962_v19, %v963_v8  ;;  %v760_v26 = vor.u32 %v758_v11, %v757_v21  ;;  %v809_v27 = vsel %vm2341_vm11, %v757_v21, 0 }
  0x5a   : > { %975 = vrot.lane.b32.xlu0 %v958_v1, %s2169_s17  ;;  %979 = vrot.lane.b32.xlu1 %v964_v25, %s2169_s17  ;;  %v685_v28 = vsel %vm681_vm8, %v679_v63, %v683_v22  ;;  %v686_v29 = vsel %vm682_vm12, %v680_v12, %v684_v23  ;;  %v1025_v32 = vshll.u32 %v809_v27, 16  ;;  %vm696_vm14 = vcmp.eq.s32.totalorder %v695_v4, 1 }
  0x5b   : > { %v902_v18 = vor.u32 %v901_v24, %v897_v16  ;;  %v687_v34 = vpack.c.bf16 %v686_v29, %v685_v28  ;;  %v2550_v35 = vsel %vm2341_vm11, 0, %v760_v26  ;;  %v1034_v36 = vrot.slane %v809_v27, 1 }
  0x5c   : > { %v1069_v37 = vsel %vm1067_vm13, %v1049_v15, 0  ;;  %v1176_v38 = vsel %vm1067_vm13, %v2126_v20, 0  ;;  %v1018_v40 = vshrl.u32 %v2550_v35, 16  ;;  %v1020_v43 = vshll.u32 %v2550_v35, 16 }
  0x5d   : > { %v907_v39 = vsel %vm811_vm9, %v902_v18, %v906_v9  ;;  %1992 = vmatpush3.bf16.msra.mxu1 %v1069_v37  ;;  %2010 = vmatpush3.bf16.msra.mxu0 %v1176_v38  ;;  %v1033_v44 = vrot.slane %v2550_v35, 1  ;;  %v697_v45 = vsel %vm696_vm14, %v687_v34, 0  ;;  %v1310_v46 = vsel %vm1067_vm13, %v2127_v31, 0 }
  0x5e   : > { %922 = vrot.lane.b32.xlu0 %v907_v39, %s2168_s19  ;;  %2081 = vmatprep.subr.msk.bf16.mxu1 %vm1067_vm13, %v2126_v20  ;;  %v1022_v47 = vrot.slane %v1020_v43, 1  ;;  %v1027_v48 = vrot.slane %v1025_v32, 1  ;;  %v762_v49 = vshrl.u32 %v697_v45, 16  ;;  %v765_v50 = vshll.u32 %v697_v45, 16 }
  0x5f   : > { %2082 = vmatprep.subr.msk.bf16.mxu0 %vm1067_vm13, %v2127_v31  ;;  %v1035_v51 = vsel %vm940_vm10, %v1033_v44, %v1034_v36  ;;  %vm981_vm15 = vcmask 31744   ;;  %vm1050_vm0 = vcmask 97280  }
  0x60   : > { %v1023_v53 = vor.u32 %v1022_v47, %v1018_v40  ;;  %1036 = vrot.lane.b32.xlu1 %v1035_v51, %s2169_s17  ;;  %v764_v54 = vrot.slane %v762_v49, 7 }
  0x62   : > { %v1028_v55 = vsel %vm811_vm9, %v1023_v53, %v1027_v48  ;;  %v767_v33 = vor.u32 %v765_v50, %v764_v54  ;;  %v810_v42 = vsel %vm2341_vm11, %v764_v54, 0  ;;  %v2636_v54 = vld [vmem:[%s2756_s7] ss:$0 sm:$0xff] }
  0x63   : > { %1029 = vrot.lane.b32.xlu0 %v1028_v55, %s2168_s19  ;;  %v1283_v56 = vshll.u32 %v810_v42, 16  ;;  %v1292_v59 = vrot.slane %v810_v42, 1 }
  0x64   : > { %v2570_v60 = vsel %vm2341_vm11, 0, %v767_v33  ;;  %vm998_vm11 = vcmask 64512  }
  0x65   : > { %v1276_v62 = vshrl.u32 %v2570_v60, 16  ;;  %v1278_v57 = vshll.u32 %v2570_v60, 16  ;;  %v1291_v63 = vrot.slane %v2570_v60, 1  ;;  %v1285_v2 = vrot.slane %v1283_v56, 1 }
  0x67   : > { %v1280_v1 = vrot.slane %v1278_v57, 1  ;;  %v1293_v3 = vsel %vm940_vm10, %v1291_v63, %v1292_v59  ;;  %vm1624_vm10 = vcmask 57344  }
  0x68   : > { %1294 = vrot.lane.b32.xlu1 %v1293_v3, %s2169_s17 }
  0x69   : > { %v1281_v4 = vor.u32 %v1280_v1, %v1276_v62 }
  0x6b   : > { %v1286_v5 = vsel %vm811_vm9, %v1281_v4, %v1285_v2  ;;  %vm1512_vm9 = vcmask 27648  }
  0x6c   : > { %1287 = vrot.lane.b32.xlu0 %v1286_v5, %s2168_s19 }
  0xa3   : > { %v913_v58 = vpop.permute.xlu1 %912 }
  0xa4   : > { %v911_v7 = vpop.permute.xlu0 %910  ;;  %v987_v16 = vsel %vm981_vm15, %v2354_v6, %v913_v58 }
  0xa5   : > { %v985_v17 = vsel %vm981_vm15, %v2360_v14, %v911_v7 }
  0xaa   : > { %v966_v8 = vpop.permute.xlu1 %965 }
  0xae   : > { %v909_v10 = vpop.permute.xlu0 %908  ;;  %v970_v11 = vpop.permute.xlu1 %969 }
  0xaf   : > { %v983_v12 = vsel %vm981_vm15, %v2401_v52, %v909_v10  ;;  %v1004_v19 = vsel %vm998_vm11, %v987_v16, %v970_v11 }
  0xb0   : > { %v1000_v15 = vsel %vm998_vm11, %v983_v12, %v966_v8 }
  0xb1   : > { %2011 = vmatprep.mubr.msk.bf16.mxu0 %vm1050_vm0, %v1000_v15 }
  0xb2   : > { %v968_v20 = vpop.permute.xlu0 %967  ;;  %v917_v22 = vpop.permute.xlu1 %916 }
  0xb3   : > { %v1002_v21 = vsel %vm998_vm11, %v985_v17, %v968_v20  ;;  %v991_v14 = vsel %vm981_vm15, %v2417_v61, %v917_v22 }
  0xb4   : > { %1993 = vmatprep.mubr.msk.bf16.mxu1 %vm1050_vm0, %v1002_v21  ;;  %2012 = vmatmul.mubr.msk.bf16.vlgmr.msra.gmra.mrb[0].mxu0 %vm1050_vm0, %v1002_v21 }
  0xb5   : > { %1994 = vmatmul.mubr.msk.bf16.vlgmr.msra.gmra.mrb[0].mxu1 %vm1050_vm0, %v1004_v19  ;;  %2015 = vmatprep.mubr.msk.bf16.mxu0 %vm1050_vm0, %v1004_v19 }
  0xb6   : > { %2046 = vmatpush3.bf16.msra.mxu1 %v1176_v38  ;;  %2028 = vmatpush3.bf16.msra.mxu0 %v1310_v46  ;;  %v974_v52 = vpop.permute.xlu1 %973 }
  0xb7   : > { %v1008_v24 = vsel %vm998_vm11, %v991_v14, %v974_v52 }
  0xb8   : > { %v915_v6 = vpop.permute.xlu0 %914 }
  0xb9   : > { %v989_v23 = vsel %vm981_vm15, %v2447_v30, %v915_v6 }
  0xbc   : > { %v972_v9 = vpop.permute.xlu0 %971 }
  0xbd   : > { %v1006_v25 = vsel %vm998_vm11, %v989_v23, %v972_v9 }
  0xbe   : > { %1997 = vmatprep.mubr.msk.bf16.mxu1 %vm1050_vm0, %v1006_v25  ;;  %2016 = vmatmul.mubr.msk.bf16.gmra.mrb[4].mxu0 %vm1050_vm0, %v1006_v25 }
  0xbf   : > { %1998 = vmatmul.mubr.msk.bf16.gmra.mrb[4].mxu1 %vm1050_vm0, %v1008_v24  ;;  %2029 = vmatprep.mubr.msk.bf16.mxu0 %vm1050_vm0, %v1004_v19 }
  0xc2   : > { %v921_v26 = vpop.permute.xlu1 %920 }
  0xc3   : > { %v995_v27 = vsel %vm981_vm15, %v2481_v13, %v921_v26 }
  0xc6   : > { %2030 = vmatmul.mubr.msk.bf16.vlgmr.msra.gmra.mrb[0].mxu0 %vm1050_vm0, %v1006_v25  ;;  %v978_v30 = vpop.permute.xlu1 %977 }
  0xc7   : > { %2033 = vmatprep.mubr.msk.bf16.mxu0 %vm1050_vm0, %v1008_v24  ;;  %v1012_v29 = vsel %vm998_vm11, %v995_v27, %v978_v30 }
  0xc8   : > { %v919_v61 = vpop.permute.xlu0 %918 }
  0xc9   : > { %v993_v28 = vsel %vm981_vm15, %v2498_v41, %v919_v61 }
  0xcc   : > { %v976_v31 = vpop.permute.xlu0 %975  ;;  %v980_v32 = vpop.permute.xlu1 %979 }
  0xcd   : > { %v1010_v18 = vsel %vm998_vm11, %v993_v28, %v976_v31 }
  0xce   : > { %2001 = vmatprep.mubr.msk.bf16.mxu1 %vm1050_vm0, %v1010_v18  ;;  %2034 = vmatmul.mubr.msk.bf16.gmra.mrb[4].mxu0 %vm1050_vm0, %v1010_v18 }
  0xcf   : > { %2002 = vmatmul.mubr.msk.bf16.gmra.mrb[8].mxu1 %vm1050_vm0, %v1012_v29  ;;  %2037 = vmatprep.mubr.msk.bf16.mxu0 %vm1050_vm0, %v1012_v29 }
  0xd0   : > { %v923_v34 = vpop.permute.xlu0 %922 }
  0xd1   : > { %v997_v13 = vsel %vm981_vm15, %v2527_v0, %v923_v34 }
  0xd2   : > { %v1014_v41 = vsel %vm998_vm11, %v997_v13, %v980_v32  ;;  %v1037_v36 = vpop.permute.xlu1 %1036 }
  0xd3   : > { %2005 = vmatprep.mubr.msk.bf16.mxu1 %vm1050_vm0, %v1014_v41 }
  0xd5   : > { %v1030_v37 = vpop.permute.xlu0 %1029 }
  0xd6   : > { %2038 = vmatmul.mubr.msk.bf16.gmra.mrb[8].mxu0 %vm1050_vm0, %v1014_v41  ;;  %v1039_v38 = vsel %vm981_vm15, %v2550_v35, %v1030_v37 }
  0xd7   : > { %v1041_v39 = vsel %vm998_vm11, %v1039_v38, %v1037_v36 }
  0xd8   : > { %2006 = vmatmul.mubr.msk.bf16.gmra.mrb[12].mxu1 %vm1050_vm0, %v1041_v39  ;;  %2041 = vmatprep.mubr.msk.bf16.mxu0 %vm1050_vm0, %v1041_v39 }
  0xd9   : > { %2019 = vmatprep.mubr.msk.bf16.mxu1 %vm1050_vm0, %v1008_v24 }
  0xda   : > { %v1295_v0 = vpop.permute.xlu1 %1294 }
  0xde   : > { %v1288_v40 = vpop.permute.xlu0 %1287 }
  0xdf   : > { %v1297_v43 = vsel %vm981_vm15, %v2570_v60, %v1288_v40 }
  0xe0   : > { %2020 = vmatmul.mubr.msk.bf16.vlgmr.msra.gmra.mrb[8].mxu1 %vm1050_vm0, %v1010_v18  ;;  %v1299_v44 = vsel %vm998_vm11, %v1297_v43, %v1295_v0 }
  0xe1   : > { %2023 = vmatprep.mubr.msk.bf16.mxu1 %vm1050_vm0, %v1012_v29  ;;  %2042 = vmatmul.mubr.msk.bf16.gmra.mrb[12].mxu0 %vm1050_vm0, %v1299_v44 }
  0xe8   : > { %2024 = vmatmul.mubr.msk.bf16.gmra.mrb[12].mxu1 %vm1050_vm0, %v1014_v41 }
 0x188   : > { %v1995_v35 = vpop.f32.mrb[0].mxu1 }
 0x189   : > { %v1105_v45 = vpop.f32.mrb[1].mxu1 }
 0x18a   : > { %v1996_v46 = vpop.f32.mrb[2].mxu1 }
 0x18b   : > { %v1108_v47 = vpop.f32.mrb[3].mxu1 }
 0x192   : > { %v1999_v48 = vpop.f32.mrb[4].mxu1 }
 0x193   : > { %v1121_v49 = vpop.f32.mrb[5].mxu1 }
 0x194   : > { %v2000_v50 = vpop.f32.mrb[6].mxu1 }
 0x195   : > { %v1124_v51 = vpop.f32.mrb[7].mxu1 }
 0x199   : > { %v2031_v53 = vpop.f32.mrb[0].mxu0 }
 0x19a   : > { %v2047_v55 = vadd.f32 %v2031_v53, %v1995_v35  ;;  %v1346_v33 = vpop.f32.mrb[1].mxu0 }
 0x19b   : > { %v2048_v42 = vadd.f32 %v1346_v33, %v1105_v45  ;;  %v2032_v56 = vpop.f32.mrb[2].mxu0 }
 0x19c   : > { %v1434_v59 = vadd.f32 %v2047_v55, %v2636_v54  ;;  %v2049_v60 = vadd.f32 %v2032_v56, %v1996_v46  ;;  %v1349_v62 = vpop.f32.mrb[3].mxu0 }
 0x19d   : > { %v1432_v57 = vadd.f32 %v2048_v42, %v2636_v54  ;;  %v2050_v63 = vadd.f32 %v1349_v62, %v1108_v47 }
 0x19e   : > { %v1903_v1 = vpack.c.bf16 %v1434_v59, %v1434_v59  ;;  %v1435_v2 = vadd.f32 %v2049_v60, %v2636_v54  ;;  %v1568_v58 = vmul.f32 %v1434_v59, %v1434_v59  ;;  %v1532_v21 = vsel %vm981_vm15, %v1434_v59, 0.0 }
 0x19f   : > { %v1901_v3 = vpack.c.bf16 %v1432_v57, %v1432_v57  ;;  %v1566_v4 = vmul.f32 %v1432_v57, %v1432_v57  ;;  %v1433_v5 = vadd.f32 %v2050_v63, %v2636_v54  ;;  %v1529_v8 = vsel %vm981_vm15, %v1432_v57, 0.0 }
 0x1a0   : > { %1515 = vst.msk [vmem:[%s2644_s18 + $0x8] sm:$0xf] %vm1512_vm9, %v1903_v1  ;;  %v1904_v7 = vpack.c.bf16 %v1435_v2, %v1435_v2  ;;  %v1569_v16 = vmul.f32 %v1435_v2, %v1435_v2  ;;  %v1585_v61 = vsel %vm981_vm15, %v1568_v58, 0.0  ;;  %v1534_v28 = vsel %vm981_vm15, %v1435_v2, 0.0 }
 0x1a1   : > { %1513 = vst.msk [vmem:[%s2644_s18] sm:$0xf] %vm1512_vm9, %v1901_v3  ;;  %v1902_v10 = vpack.c.bf16 %v1433_v5, %v1433_v5  ;;  %v1530_v11 = vsel %vm981_vm15, %v1433_v5, 0.0  ;;  %v1567_v12 = vmul.f32 %v1433_v5, %v1433_v5  ;;  %v2035_v15 = vpop.f32.mrb[4].mxu0  ;;  %v1582_v22 = vsel %vm981_vm15, %v1566_v4, 0.0 }
 0x1a2   : > { %1516 = vst.msk [vmem:[%s2644_s18 + $0xc] sm:$0xf] %vm1512_vm9, %v1904_v7  ;;  %v1531_v17 = vadd.f32 %v1530_v11, %v1529_v8  ;;  %v2051_v19 = vadd.f32 %v2035_v15, %v1999_v48  ;;  %v1362_v20 = vpop.f32.mrb[5].mxu0  ;;  %v1587_v29 = vsel %vm981_vm15, %v1569_v16, 0.0 }
 0x1a3   : > { %1514 = vst.msk [vmem:[%s2644_s18 + $0x4] sm:$0xf] %vm1512_vm9, %v1902_v10  ;;  %v1583_v6 = vsel %vm981_vm15, %v1567_v12, 0.0  ;;  %v2052_v52 = vadd.f32 %v1362_v20, %v1121_v49  ;;  %v2036_v14 = vpop.f32.mrb[6].mxu0 }
 0x1a4   : > { %v1533_v23 = vadd.f32 %v1532_v21, %v1531_v17  ;;  %v1584_v24 = vadd.f32 %v1583_v6, %v1582_v22  ;;  %v1438_v9 = vadd.f32 %v2051_v19, %v2636_v54  ;;  %v2053_v25 = vadd.f32 %v2036_v14, %v2000_v50  ;;  %v1365_v26 = vpop.f32.mrb[7].mxu0 }
 0x1a5   : > { %v1436_v30 = vadd.f32 %v2052_v52, %v2636_v54  ;;  %v2054_v27 = vadd.f32 %v1365_v26, %v1124_v51 }
 0x1a6   : > { %v1586_v31 = vadd.f32 %v1585_v61, %v1584_v24  ;;  %v1907_v18 = vpack.c.bf16 %v1438_v9, %v1438_v9  ;;  %v1535_v34 = vadd.f32 %v1534_v28, %v1533_v23  ;;  %v1439_v37 = vadd.f32 %v2053_v25, %v2636_v54 }
 0x1a7   : > { %v1905_v32 = vpack.c.bf16 %v1436_v30, %v1436_v30  ;;  %v1536_v13 = vsel %vm981_vm15, %v1436_v30, 0.0  ;;  %v1570_v41 = vmul.f32 %v1436_v30, %v1436_v30  ;;  %v1437_v38 = vadd.f32 %v2054_v27, %v2636_v54 }
 0x1a8   : > { %1519 = vst.msk [vmem:[%s2644_s18 + $0x18] sm:$0xf] %vm1512_vm9, %v1907_v18  ;;  %v1588_v36 = vadd.f32 %v1587_v29, %v1586_v31  ;;  %v1537_v39 = vadd.f32 %v1536_v13, %v1535_v34  ;;  %v1908_v44 = vpack.c.bf16 %v1439_v37, %v1439_v37  ;;  %v1572_v45 = vmul.f32 %v1438_v9, %v1438_v9 }
 0x1a9   : > { %1517 = vst.msk [vmem:[%s2644_s18 + $0x10] sm:$0xf] %vm1512_vm9, %v1905_v32  ;;  %v1589_v0 = vsel %vm981_vm15, %v1570_v41, 0.0  ;;  %v2039_v40 = vpop.f32.mrb[8].mxu0  ;;  %v1906_v46 = vpack.c.bf16 %v1437_v38, %v1437_v38  ;;  %v1538_v47 = vsel %vm981_vm15, %v1437_v38, 0.0  ;;  %v1571_v48 = vmul.f32 %v1437_v38, %v1437_v38 }
 0x1aa   : > { %v1590_v43 = vadd.f32 %v1589_v0, %v1588_v36  ;;  %v1378_v35 = vpop.f32.mrb[9].mxu0  ;;  %1520 = vst.msk [vmem:[%s2644_s18 + $0x1c] sm:$0xf] %vm1512_vm9, %v1908_v44  ;;  %v1539_v50 = vadd.f32 %v1538_v47, %v1537_v39  ;;  %v1540_v53 = vsel %vm981_vm15, %v1438_v9, 0.0  ;;  %v1573_v55 = vmul.f32 %v1439_v37, %v1439_v37 }
 0x1ab   : > { %v2040_v49 = vpop.f32.mrb[10].mxu0  ;;  %1518 = vst.msk [vmem:[%s2644_s18 + $0x14] sm:$0xf] %vm1512_vm9, %v1906_v46  ;;  %v1591_v33 = vsel %vm981_vm15, %v1571_v48, 0.0  ;;  %v1593_v59 = vsel %vm981_vm15, %v1572_v45, 0.0  ;;  %v1542_v60 = vsel %vm981_vm15, %v1439_v37, 0.0 }
 0x1ac   : > { %v1381_v51 = vpop.f32.mrb[11].mxu0  ;;  %v1541_v42 = vadd.f32 %v1540_v53, %v1539_v50  ;;  %v1592_v56 = vadd.f32 %v1591_v33, %v1590_v43  ;;  %v1595_v63 = vsel %vm981_vm15, %v1573_v55, 0.0 }
 0x1ae   : > { %v1594_v62 = vadd.f32 %v1593_v59, %v1592_v56  ;;  %v1543_v57 = vadd.f32 %v1542_v60, %v1541_v42 }
 0x1b0   : > { %v1596_v1 = vadd.f32 %v1595_v63, %v1594_v62 }
 0x1b3   : > { %v2021_v2 = vpop.f32.mrb[8].mxu1 }
 0x1b4   : > { %v2055_v3 = vadd.f32 %v2039_v40, %v2021_v2  ;;  %v1244_v4 = vpop.f32.mrb[9].mxu1  ;;  %v2043_v5 = vpop.f32.mrb[12].mxu0 }
 0x1b5   : > { %v2056_v58 = vadd.f32 %v1378_v35, %v1244_v4  ;;  %v2022_v7 = vpop.f32.mrb[10].mxu1  ;;  %v1394_v8 = vpop.f32.mrb[13].mxu0 }
 0x1b6   : > { %v1442_v10 = vadd.f32 %v2055_v3, %v2636_v54  ;;  %v2057_v11 = vadd.f32 %v2040_v49, %v2022_v7  ;;  %v1247_v12 = vpop.f32.mrb[11].mxu1  ;;  %v2044_v15 = vpop.f32.mrb[14].mxu0 }
 0x1b7   : > { %v1440_v16 = vadd.f32 %v2056_v58, %v2636_v54  ;;  %v2058_v17 = vadd.f32 %v1381_v51, %v1247_v12  ;;  %v1397_v19 = vpop.f32.mrb[15].mxu0 }
 0x1b8   : > { %v1911_v20 = vpack.c.bf16 %v1442_v10, %v1442_v10  ;;  %v1443_v21 = vadd.f32 %v2057_v11, %v2636_v54  ;;  %v1576_v9 = vmul.f32 %v1442_v10, %v1442_v10  ;;  %v1548_v32 = vsel %vm981_vm15, %v1442_v10, 0.0 }
 0x1b9   : > { %v1909_v22 = vpack.c.bf16 %v1440_v16, %v1440_v16  ;;  %v1544_v6 = vsel %vm981_vm15, %v1440_v16, 0.0  ;;  %v1574_v52 = vmul.f32 %v1440_v16, %v1440_v16  ;;  %v1441_v14 = vadd.f32 %v2058_v17, %v2636_v54 }
 0x1ba   : > { %1523 = vst.msk [vmem:[%s2644_s18 + $0x28] sm:$0xf] %vm1512_vm9, %v1911_v20  ;;  %v1545_v23 = vadd.f32 %v1544_v6, %v1543_v57  ;;  %v1912_v24 = vpack.c.bf16 %v1443_v21, %v1443_v21  ;;  %v1577_v34 = vmul.f32 %v1443_v21, %v1443_v21  ;;  %v1550_v40 = vsel %vm981_vm15, %v1443_v21, 0.0 }
 0x1bb   : > { %1521 = vst.msk [vmem:[%s2644_s18 + $0x20] sm:$0xf] %vm1512_vm9, %v1909_v22  ;;  %v1597_v25 = vsel %vm981_vm15, %v1574_v52, 0.0  ;;  %v1910_v26 = vpack.c.bf16 %v1441_v14, %v1441_v14  ;;  %v1546_v61 = vsel %vm981_vm15, %v1441_v14, 0.0  ;;  %v2025_v30 = vpop.f32.mrb[12].mxu1  ;;  %v1575_v29 = vmul.f32 %v1441_v14, %v1441_v14 }
 0x1bc   : > { %v1598_v27 = vadd.f32 %v1597_v25, %v1596_v1  ;;  %1524 = vst.msk [vmem:[%s2644_s18 + $0x2c] sm:$0xf] %vm1512_vm9, %v1912_v24  ;;  %v1547_v28 = vadd.f32 %v1546_v61, %v1545_v23  ;;  %v2059_v31 = vadd.f32 %v2043_v5, %v2025_v30  ;;  %v1260_v18 = vpop.f32.mrb[13].mxu1  ;;  %v1601_v45 = vsel %vm981_vm15, %v1576_v9, 0.0 }
 0x1bd   : > { %1522 = vst.msk [vmem:[%s2644_s18 + $0x24] sm:$0xf] %vm1512_vm9, %v1910_v26  ;;  %v2060_v13 = vadd.f32 %v1394_v8, %v1260_v18  ;;  %v2026_v41 = vpop.f32.mrb[14].mxu1  ;;  %v1599_v37 = vsel %vm981_vm15, %v1575_v29, 0.0  ;;  %v1603_v53 = vsel %vm981_vm15, %v1577_v34, 0.0 }
 0x1be   : > { %v1549_v36 = vadd.f32 %v1548_v32, %v1547_v28  ;;  %v1446_v38 = vadd.f32 %v2059_v31, %v2636_v54  ;;  %v2061_v39 = vadd.f32 %v2044_v15, %v2026_v41  ;;  %v1263_v0 = vpop.f32.mrb[15].mxu1  ;;  %v1600_v43 = vadd.f32 %v1599_v37, %v1598_v27 }
 0x1bf   : > { %v1444_v44 = vadd.f32 %v2060_v13, %v2636_v54  ;;  %v2062_v35 = vadd.f32 %v1397_v19, %v1263_v0 }
 0x1c0   : > { %v1915_v46 = vpack.c.bf16 %v1446_v38, %v1446_v38  ;;  %v1551_v47 = vadd.f32 %v1550_v40, %v1549_v36  ;;  %v1602_v48 = vadd.f32 %v1601_v45, %v1600_v43  ;;  %v1447_v33 = vadd.f32 %v2061_v39, %v2636_v54 }
 0x1c1   : > { %v1913_v49 = vpack.c.bf16 %v1444_v44, %v1444_v44  ;;  %v1552_v50 = vsel %vm981_vm15, %v1444_v44, 0.0  ;;  %v1578_v51 = vmul.f32 %v1444_v44, %v1444_v44  ;;  %v1445_v42 = vadd.f32 %v2062_v35, %v2636_v54 }
 0x1c2   : > { %1527 = vst.msk [vmem:[%s2644_s18 + $0x38] sm:$0xf] %vm1512_vm9, %v1915_v46  ;;  %v1553_v55 = vadd.f32 %v1552_v50, %v1551_v47  ;;  %v1604_v56 = vadd.f32 %v1603_v53, %v1602_v48  ;;  %v1916_v60 = vpack.c.bf16 %v1447_v33, %v1447_v33  ;;  %v1580_v57 = vmul.f32 %v1446_v38, %v1446_v38 }
 0x1c3   : > { %1525 = vst.msk [vmem:[%s2644_s18 + $0x30] sm:$0xf] %vm1512_vm9, %v1913_v49  ;;  %v1605_v59 = vsel %vm981_vm15, %v1578_v51, 0.0  ;;  %v1914_v62 = vpack.c.bf16 %v1445_v42, %v1445_v42  ;;  %v1554_v1 = vsel %vm981_vm15, %v1445_v42, 0.0  ;;  %v1579_v2 = vmul.f32 %v1445_v42, %v1445_v42 }
 0x1c4   : > { %v1606_v63 = vadd.f32 %v1605_v59, %v1604_v56  ;;  %1528 = vst.msk [vmem:[%s2644_s18 + $0x3c] sm:$0xf] %vm1512_vm9, %v1916_v60  ;;  %v1555_v3 = vadd.f32 %v1554_v1, %v1553_v55  ;;  %v1556_v4 = vsel %vm981_vm15, %v1446_v38, 0.0  ;;  %v1581_v54 = vmul.f32 %v1447_v33, %v1447_v33 }
 0x1c5   : > { %1526 = vst.msk [vmem:[%s2644_s18 + $0x34] sm:$0xf] %vm1512_vm9, %v1914_v62  ;;  %v1607_v5 = vsel %vm981_vm15, %v1579_v2, 0.0  ;;  %v1609_v8 = vsel %vm981_vm15, %v1580_v57, 0.0  ;;  %v1558_v10 = vsel %vm981_vm15, %v1447_v33, 0.0 }
 0x1c6   : > { %v1557_v58 = vadd.f32 %v1556_v4, %v1555_v3  ;;  %v1608_v7 = vadd.f32 %v1607_v5, %v1606_v63  ;;  %v1611_v15 = vsel %vm981_vm15, %v1581_v54, 0.0 }
 0x1c8   : > { %v1559_v11 = vadd.f32 %v1558_v10, %v1557_v58  ;;  %v1610_v12 = vadd.f32 %v1609_v8, %v1608_v7 }
 0x1ca   : > { %v1612_v16 = vadd.f32 %v1611_v15, %v1610_v12  ;;  %v1560_v52 = vrot.slane %v1559_v11, 4 }
 0x1cc   : > { %v1613_v17 = vrot.slane %v1612_v16, 4  ;;  %v1561_v14 = vadd.f32 %v1560_v52, %v1559_v11 }
 0x1ce   : > { %v1614_v19 = vadd.f32 %v1613_v17, %v1612_v16  ;;  %v1562_v23 = vrot.slane %v1561_v14, 2 }
 0x1d0   : > { %v1615_v20 = vrot.slane %v1614_v19, 2  ;;  %v1563_v24 = vadd.f32 %v1562_v23, %v1561_v14 }
 0x1d2   : > { %v1616_v21 = vadd.f32 %v1615_v20, %v1614_v19  ;;  %v1564_v9 = vrot.slane %v1563_v24, 1 }
 0x1d4   : > { %v1617_v22 = vrot.slane %v1616_v21, 1  ;;  %v1565_v25 = vadd.f32 %v1564_v9, %v1563_v24 }
 0x1d6   : > { %v1618_v6 = vadd.f32 %v1617_v22, %v1616_v21 }
 0x1d8   : > { %1620 = vrot.lane.b32.xlu0 %v1618_v6, %s2168_s19 }
 0x24a   : > { %v1621_v26 = vpop.permute.xlu0 %1620 }
 0x24b   : > { %v1623_v61 = vsel %vm981_vm15, %v1565_v25, %v1621_v26 }
 0x24c   : > { %1625 = vst.msk [vmem:[%s520_s29] sm:$0x1] %vm1624_vm10, %v1623_v61 }
 0x24d PF: > { %s21_s15 = sadd.s32 1, %s2166_s15   ;;  %s2764_s11 = smov %s2158_s13 }
 0x24e   : > { %p18_p12 = scmp.ge.s32.totalorder %s21_s15, 6   ;;  %s2765_s12 = smov %s2162_s14 }
 0x24f   : > { %s2766_s13 = smov %s2769_s5  ;;  %s2767_s14 = smov %s2773_s16 }
 0x250   :  { %20 = sbr.rel (!%p18_p12) target bundleno = 3 (0x3), region = 100 }

// kernel: _forward.3
= control target key start
LH: loop header
LB: loop body
LE: loop exit
PB: predicated region body
PF: predicated region fallthrough
CT: control target
= control target key end

     0   :  { %s1998_s21 = smov 0   ;;  %s2000_s22 = smov 0   ;;  %s2435_s0 = inlined_call_operand.vmem [shape: bf16[2,16,16,4], index: 0, kind: input, shape index: {}, may-alias: {0,1,2}]   ;;  %s2436_s1 = inlined_call_operand.vmem [shape: bf16[2,16,16,4], index: 1, kind: input, shape index: {}, may-alias: {0,1,2}]   ;;  %s2437_s2 = inlined_call_operand.vmem [shape: bf16[2,16,16,4], index: 2, kind: input, shape index: {}, may-alias: {0,1,2}]   ;;  %s2438_s3 = inlined_call_operand.vmem [shape: bf16[36,4], index: 3, kind: input, shape index: {}]   ;;  %s2439_s4 = inlined_call_operand.vmem [shape: f32[1,4], index: 4, kind: input, shape index: {}]   ;;  %s2440_s5 = inlined_call_operand.vmem [shape: bf16[2,16,16,4], index: 5, kind: output, shape index: {0}]   ;;  %s2441_s6 = inlined_call_operand.vmem [shape: f32[2,2,1,8], index: 6, kind: output, shape index: {1}]  }
   0x1   :  { %s2002_s23 = smov 0   ;;  %s2004_s24 = smov 0  }
   0x2   :  { %s2006_s25 = smov 0  }
   0x3 LB: > { %s26_s26 = sadd.s32 1, %s1951_s23  ;;  %s29_s27 = sadd.s32 1, %s1955_s24  ;;  %s1959_s25 = sphi %s2006_s25, %s17_s25   ;;  %s1955_s24 = sphi %s2004_s24, %s2450_s24   ;;  %s1951_s23 = sphi %s2002_s23, %s2449_s23   ;;  %s1947_s22 = sphi %s2000_s22, %s2448_s22   ;;  %s1943_s21 = sphi %s1998_s21, %s2447_s21  }
   0x4   : > { %p27_p0 = scmp.ge.s32.totalorder %s26_s26, 2  ;;  %p1642_p1 = scmp.ge.s32.totalorder %s1959_s25, 1 }
   0x5   : > { %p303_p2 = scmp.lt.s32.totalorder %s1959_s25, 5 }
   0x6   : > { %s2452_s26 = smov (%p27_p0, %s26_s26), 0  ;;  %s2454_s27 = smov (!%p27_p0, %s29_s27), %s1955_s24 }
   0x7   : > { %p304_p3 = pnand %p1642_p1, %p303_p2  ;;  %p31_p4 = scmp.ge.s32.totalorder %s2454_s27, 2 }
   0x8   : > { %s2031_s28 = sshll.u32 (!%p304_p3), %s1943_s21, 3  ;;  %p380_p5 = scmp.lt.s32.totalorder (!%p304_p3), %s1947_s22, 1  ;;  %vm613_vm0 = vsmask.f32 (!%p304_p3), 256  ;;  %vm612_vm1 = vcmask (!%p304_p3), 1040384   ;;  %vm764_vm5 = vcmask (!%p304_p3), 1046528  }
   0x9   : > { %s2456_s27 = smov (%p31_p4, %s2454_s27), 0  ;;  %307 = sbr.rel (%p304_p3) target bundleno = 567 (0x237), region = 40 }
   0xa   : > { %p396_p6 = scmp.lt.s32.totalorder (!%p304_p3), %s2031_s28, 15  ;;  %s1644_s7 = sadd.s32 (!%p304_p3), 4294967295, %s2031_s28  ;;  %vm2057_vm2 = vmand (!%p304_p3), %vm612_vm1, %vm613_vm0  ;;  %vm635_vm4 = vsmask.f32 (!%p304_p3), 7424  ;;  %vm891_vm7 = vcmask (!%p304_p3), 1045504   ;;  %vm822_vm8 = vcmask (!%p304_p3), 64512  }
   0xb   : > { %p378_p7 = scmp.gt.s32.totalorder (!%p304_p3), %s1644_s7, 0  ;;  %p1645_p8 = scmp.lt.s32.totalorder (!%p304_p3), %s1644_s7, 15  ;;  %vm805_vm9 = vcmask (!%p304_p3), 31744   ;;  %vm874_vm10 = vcmask (!%p304_p3), 97280   ;;  %vm1336_vm11 = vcmask (!%p304_p3), 27648   ;;  %vm1448_vm12 = vcmask (!%p304_p3), 57344  }
   0xc   : > { %p460_p9 = scmp.gt.s32.totalorder (!%p304_p3), %s1943_s21, 0  ;;  %p434_p11 = scmp.lt.s32.totalorder (!%p304_p3), %s1943_s21, 1 }
  0x10   : > { %s2458_s22 = smov (!%p380_p5, %s1947_s22), 1  ;;  %s2460_s7 = smov (!%p378_p7, %s1644_s7), 0 }
  0x11   : > { %s397_s29 = scalar_select %p396_p6, %s2031_s28, 15 }
  0x12   : > { %s2038_s30 = sshll.u32 %s2458_s22, 5  ;;  %s2462_s7 = smov (!%p1645_p8, %s2460_s7), 15 }
  0x13   : > { %s1654_s8 = sshll.u32 %s397_s29, 1  ;;  %s1650_s15 = sshll.u32 %s2462_s7, 1 }
  0x14   : > { %s2042_s9 = sadd.s32 %s1654_s8, %s2038_s30  ;;  %s386_s16 = sadd.s32 %s2038_s30, %s1650_s15 }
  0x15   : > { %s1656_s10 = sshll.u32 %s2042_s9, 2  ;;  %s1652_s17 = sshll.u32 %s386_s16, 2 }
  0x16   : > { %s2050_s13 = scalar_lea.vmem %s2436_s1, %s1656_s10  ;;  %s388_s20 = scalar_lea.vmem %s2435_s0, %s1652_s17 }
  0x17   : > { %v1910_v0 = vld [vmem:[%s2050_s13 + $0x8] sm:$0xff]   ;;  %v1911_v1 = vld [vmem:[%s2050_s13] sm:$0xff]   ;;  %v1912_v4 = vld [vmem:[%s2050_s13 + $0x18] sm:$0xff]   ;;  %s461_s14 = scalar_select %p460_p9, 1, 0 }
  0x18   : > { %v537_v2 = vshrl.u32 %v1910_v0, 16  ;;  %v540_v3 = vshll.u32 %v1910_v0, 16  ;;  %v530_v5 = vshrl.u32 %v1911_v1, 16  ;;  %v533_v6 = vshll.u32 %v1911_v1, 16  ;;  %v456_v22 = vld [vmem:[%s388_s20] sm:$0xf] }
  0x19   : > { %v551_v8 = vshrl.u32 %v1912_v4, 16  ;;  %v554_v9 = vshll.u32 %v1912_v4, 16  ;;  %v462_v12 = vstv %s461_s14  ;;  %v457_v23 = vld [vmem:[%s388_s20 + $0x4] sm:$0xf]  ;;  %s1732_s29 = sadd.s32 8, %s2031_s28  ;;  %v1913_v34 = vld [vmem:[%s2050_s13 + $0x10] sm:$0xff]  }
  0x1a   : > { %v539_v7 = vrot.slane %v537_v2, 7  ;;  %v532_v11 = vrot.slane %v530_v5, 7  ;;  %vm2071_vm3 = vcmp.eq.s32.totalorder %v462_v12, 1  ;;  %v1914_v45 = vld [vmem:[%s2050_s13 + $0x28] sm:$0xff]   ;;  %p2102_p10 = scmp.lt.s32.totalorder %s1732_s29, 15  ;;  %v544_v49 = vshrl.u32 %v1913_v34, 16 }
  0x1b   : > { %v553_v15 = vrot.slane %v551_v8, 7  ;;  %v464_v30 = vsel %vm2071_vm3, %v456_v22, 0  ;;  %v465_v33 = vsel %vm2071_vm3, %v457_v23, 0  ;;  %s1961_s8 = smov 4   ;;  %v547_v53 = vshll.u32 %v1913_v34, 16  ;;  %s1962_s28 = smov 8  }
  0x1c   : > { %v542_v13 = vor.u32 %v540_v3, %v539_v7  ;;  %v627_v14 = vsel %vm2057_vm2, %v539_v7, 0  ;;  %v535_v17 = vor.u32 %v533_v6, %v532_v11  ;;  %v2066_v18 = vsel %vm2057_vm2, %v532_v11, 0  ;;  %s2464_s29 = smov (!%p2102_p10, %s1732_s29), 15  ;;  %v1915_v11 = vld [vmem:[%s2050_s13 + $0x20] sm:$0xff]   ;;  %s2468_s21 = smov (!%p434_p11, %s1943_s21), 1 }
  0x1d   : > { %v668_v16 = vshll.u32 %v627_v14, 16  ;;  %v656_v21 = vshll.u32 %v2066_v18, 16  ;;  %v556_v24 = vor.u32 %v554_v9, %v553_v15  ;;  %v1669_v37 = vcombine.low %v464_v30, %v465_v33  ;;  %s2466_s29 = smov (!%p2102_p10, %s2464_s29), 15  ;;  %s1668_s9 = sshll.u32 %s2458_s22, 1 }
  0x1e   : > { %v2077_v20 = vsel %vm2057_vm2, 0, %v542_v13  ;;  %v2084_v27 = vsel %vm2057_vm2, 0, %v535_v17  ;;  %v772_v41 = vrot.slane %v627_v14, 1  ;;  %v629_v47 = vsel %vm2057_vm2, %v553_v15, 0  ;;  %s2155_s11 = sshll.u32 %s2466_s29, 1 }
  0x1f   : > { %v661_v25 = vshrl.u32 %v2077_v20, 16  ;;  %v663_v26 = vshll.u32 %v2077_v20, 16  ;;  %v649_v28 = vshrl.u32 %v2084_v27, 16  ;;  %v651_v29 = vshll.u32 %v2084_v27, 16  ;;  %s414_s12 = sadd.s32 %s2155_s11, %s2038_s30 }
  0x20   : > { %v670_v32 = vrot.slane %v668_v16, 1  ;;  %v658_v36 = vrot.slane %v656_v21, 1  ;;  %v2096_v38 = vsel %vm2057_vm2, 0, %v556_v24  ;;  %v771_v40 = vrot.slane %v2077_v20, 1  ;;  %s1663_s30 = sshll.u32 %s414_s12, 2 }
  0x21   : > { %v665_v31 = vrot.slane %v663_v26, 1  ;;  %v653_v35 = vrot.slane %v651_v29, 1  ;;  %v523_v43 = vshrl.u32 %v1669_v37, 16  ;;  %v526_v44 = vshll.u32 %v1669_v37, 16  ;;  %s416_s16 = scalar_lea.vmem %s2437_s2, %s1663_s30 }
  0x22   : > { %v687_v48 = vshll.u32 %v2096_v38, 16  ;;  %v768_v52 = vrot.slane %v2084_v27, 1  ;;  %v773_v54 = vsel %vm764_vm5, %v771_v40, %v772_v41  ;;  %v769_v55 = vrot.slane %v2066_v18, 1 }
  0x23   : > { %v666_v39 = vor.u32 %v665_v31, %v661_v25  ;;  %v654_v42 = vor.u32 %v653_v35, %v649_v28  ;;  %v525_v51 = vrot.slane %v523_v43, 7  ;;  %v685_v56 = vshrl.u32 %v2096_v38, 16  ;;  %v1916_v25 = vld [vmem:[%s2050_s13 + $0x30] sm:$0xff]   ;;  %v1917_v31 = vld [vmem:[%s2050_s13 + $0x38] sm:$0xff]   ;;  %s2187_s13 = scalar_select %p434_p11, 1, 0 }
  0x24   : > { %v546_v57 = vrot.slane %v544_v49, 7  ;;  %v692_v60 = vshll.u32 %v629_v47, 16  ;;  %v565_v61 = vshrl.u32 %v1914_v45, 16  ;;  %v689_v0 = vrot.slane %v687_v48, 1 }
  0x25   : > { %v671_v46 = vsel %vm635_vm4, %v666_v39, %v670_v32  ;;  %v659_v50 = vsel %vm635_vm4, %v654_v42, %v658_v36  ;;  %v528_v58 = vor.u32 %v526_v44, %v525_v51  ;;  %v625_v59 = vsel %vm2057_vm2, %v525_v51, 0 }
  0x26   : > { %736 = vrot.lane.b32.xlu1 %v671_v46, %s1961_s8  ;;  %734 = vrot.lane.b32.xlu0 %v659_v50, %s1961_s8  ;;  %v766_v62 = vrot.slane %v625_v59, 1  ;;  %v644_v63 = vshll.u32 %v625_v59, 16  ;;  %v549_v1 = vor.u32 %v547_v53, %v546_v57  ;;  %v2131_v3 = vsel %vm2057_vm2, %v546_v57, 0 }
  0x27   : > { %v2127_v2 = vsel %vm2057_vm2, 0, %v528_v58  ;;  %v567_v4 = vrot.slane %v565_v61, 7  ;;  %v568_v5 = vshll.u32 %v1914_v45, 16  ;;  %v777_v9 = vrot.slane %v2096_v38, 1 }
  0x28   : > { %v765_v6 = vrot.slane %v2127_v2, 1  ;;  %v637_v7 = vshrl.u32 %v2127_v2, 16  ;;  %v639_v8 = vshll.u32 %v2127_v2, 16  ;;  %v646_v12 = vrot.slane %v644_v63, 1 }
  0x29   : > { %v2143_v13 = vsel %vm2057_vm2, 0, %v549_v1  ;;  %v680_v14 = vshll.u32 %v2131_v3, 16  ;;  %v778_v15 = vrot.slane %v629_v47, 1  ;;  %v690_v21 = vor.u32 %v689_v0, %v685_v56 }
  0x2a   : > { %v767_v16 = vsel %vm764_vm5, %v765_v6, %v766_v62  ;;  %v641_v17 = vrot.slane %v639_v8, 1  ;;  %v673_v18 = vshrl.u32 %v2143_v13, 16  ;;  %v675_v19 = vshll.u32 %v2143_v13, 16 }
  0x2b   : > { %789 = vrot.lane.b32.xlu1 %v767_v16, %s1962_s28  ;;  %v694_v22 = vrot.slane %v692_v60, 1  ;;  %v570_v23 = vor.u32 %v568_v5, %v567_v4  ;;  %v631_v24 = vsel %vm2057_vm2, %v567_v4, 0  ;;  %v770_v28 = vsel %vm764_vm5, %v768_v52, %v769_v55  ;;  %v458_v16 = vld [vmem:[%s416_s16] sm:$0xf] }
  0x2c   : > { %v642_v26 = vor.u32 %v641_v17, %v637_v7  ;;  %v677_v29 = vrot.slane %v675_v19, 1  ;;  %v558_v30 = vshrl.u32 %v1915_v11, 16  ;;  %v682_v32 = vrot.slane %v680_v14, 1  ;;  %v1919_v17 = vld [vmem:[%s2438_s3] sm:$0x3f]  }
  0x2d   : > { %v779_v33 = vsel %vm764_vm5, %v777_v9, %v778_v15  ;;  %v2160_v34 = vsel %vm2057_vm2, 0, %v570_v23  ;;  %v561_v35 = vshll.u32 %v1915_v11, 16  ;;  %v716_v40 = vshll.u32 %v631_v24, 16  ;;  %1865 = vmatprep.subr.msk.bf16.mxu0 %vm891_vm7, %v1919_v17 }
  0x2e   : > { %v647_v36 = vsel %vm635_vm4, %v642_v26, %v646_v12  ;;  %v678_v37 = vor.u32 %v677_v29, %v673_v18  ;;  %v711_v39 = vshll.u32 %v2160_v34, 16  ;;  %v695_v41 = vsel %vm635_vm4, %v690_v21, %v694_v22  ;;  %v459_v21 = vld [vmem:[%s416_s16 + $0x4] sm:$0xf]  ;;  %v1920_v29 = vld [vmem:[%s2438_s3 + $0xc] sm:$0x3f]  }
  0x2f   : > { %732 = vrot.lane.b32.xlu0 %v647_v36, %s1961_s8  ;;  %793 = vrot.lane.b32.xlu1 %v773_v54, %s1962_s28  ;;  %v775_v42 = vrot.slane %v2131_v3, 1  ;;  %v560_v43 = vrot.slane %v558_v30, 7  ;;  %v572_v44 = vshrl.u32 %v1916_v25, 16  ;;  %v709_v45 = vshrl.u32 %v2160_v34, 16  ;;  %v1918_v3 = vld [vmem:[%s2438_s3 + $0x4] sm:$0xfc]  }
  0x30   : > { %v713_v46 = vrot.slane %v711_v39, 1  ;;  %v575_v47 = vshll.u32 %v1916_v25, 16  ;;  %v579_v48 = vshrl.u32 %v1917_v31, 16  ;;  %v774_v49 = vrot.slane %v2143_v13, 1 }
  0x31   : > { %v563_v50 = vor.u32 %v561_v35, %v560_v43  ;;  %v630_v51 = vsel %vm2057_vm2, %v560_v43, 0  ;;  %v574_v52 = vrot.slane %v572_v44, 7  ;;  %v683_v53 = vsel %vm635_vm4, %v678_v37, %v682_v32 }
  0x32   : > { %v718_v54 = vrot.slane %v716_v40, 1  ;;  %v783_v55 = vrot.slane %v2160_v34, 1  ;;  %v784_v56 = vrot.slane %v631_v24, 1  ;;  %v581_v59 = vrot.slane %v579_v48, 7 }
  0x33   : > { %791 = vrot.lane.b32.xlu0 %v770_v28, %s1962_s28  ;;  %740 = vrot.lane.b32.xlu1 %v695_v41, %s1961_s8  ;;  %v2181_v57 = vsel %vm2057_vm2, 0, %v563_v50  ;;  %v577_v58 = vor.u32 %v575_v47, %v574_v52  ;;  %v582_v60 = vshll.u32 %v1917_v31, 16  ;;  %v714_v61 = vor.u32 %v713_v46, %v709_v45 }
  0x34   : > { %v697_v62 = vshrl.u32 %v2181_v57, 16  ;;  %v699_v63 = vshll.u32 %v2181_v57, 16  ;;  %v704_v0 = vshll.u32 %v630_v51, 16  ;;  %v776_v4 = vsel %vm764_vm5, %v774_v49, %v775_v42 }
  0x35   : > { %v2191_v1 = vsel %vm2057_vm2, 0, %v577_v58  ;;  %v785_v6 = vsel %vm764_vm5, %v783_v55, %v784_v56  ;;  %v632_v7 = vsel %vm2057_vm2, %v574_v52, 0  ;;  %v584_v9 = vor.u32 %v582_v60, %v581_v59 }
  0x36   : > { %v701_v5 = vrot.slane %v699_v63, 1  ;;  %v723_v8 = vshll.u32 %v2191_v1, 16  ;;  %v719_v11 = vsel %vm635_vm4, %v714_v61, %v718_v54  ;;  %v706_v14 = vrot.slane %v704_v0, 1 }
  0x37   : > { %738 = vrot.lane.b32.xlu0 %v683_v53, %s1961_s8  ;;  %797 = vrot.lane.b32.xlu1 %v779_v33, %s1962_s28  ;;  %v781_v15 = vrot.slane %v630_v51, 1  ;;  %v780_v18 = vrot.slane %v2181_v57, 1  ;;  %v2213_v19 = vsel %vm2057_vm2, 0, %v584_v9  ;;  %v468_v22 = vstv %s2187_s13  ;;  %s2330_s13 = scalar_lea.vmem %s2440_s5, %s1656_s10  ;;  %s437_s10 = sadd.s32 %s1668_s9, %s2468_s21 }
  0x38   : > { %v702_v12 = vor.u32 %v701_v5, %v697_v62  ;;  %v873_v23 = vrot.slane %v1918_v3, 2  ;;  %v721_v24 = vshrl.u32 %v2191_v1, 16  ;;  %v728_v25 = vshll.u32 %v632_v7, 16  ;;  %s438_s16 = scalar_lea.vmem %s2441_s6, %s437_s10 }
  0x39   : > { %v786_v26 = vrot.slane %v2191_v1, 1  ;;  %v787_v28 = vrot.slane %v632_v7, 1  ;;  %v725_v30 = vrot.slane %v723_v8, 1  ;;  %v633_v31 = vsel %vm2057_vm2, %v581_v59, 0 }
  0x3a   : > { %vm469_vm6 = vcmp.eq.s32.totalorder %v468_v22, 1  ;;  %v707_v32 = vsel %vm635_vm4, %v702_v12, %v706_v14  ;;  %v844_v33 = vshll.u32 %v2213_v19, 16  ;;  %1864 = vmatprep.subr.msk.bf16.mxu1 %vm891_vm7, %v873_v23  ;;  %v893_v39 = vsel %vm891_vm7, %v873_v23, 0 }
  0x3b   : > { %795 = vrot.lane.b32.xlu0 %v776_v4, %s1962_s28  ;;  %744 = vrot.lane.b32.xlu1 %v719_v11, %s1961_s8  ;;  %v470_v35 = vsel %vm469_vm6, %v458_v16, 0  ;;  %v471_v36 = vsel %vm469_vm6, %v459_v21, 0  ;;  %v2231_v40 = vsel %vm891_vm7, %v1919_v17, 0  ;;  %v782_v41 = vsel %vm764_vm5, %v780_v18, %v781_v15 }
  0x3c   : > { %v1678_v37 = vcombine.low %v470_v35, %v471_v36  ;;  %v730_v42 = vrot.slane %v728_v25, 1  ;;  %v788_v43 = vsel %vm764_vm5, %v786_v26, %v787_v28  ;;  %1777 = vmatpush3.bf16.msra.mxu1 %v893_v39  ;;  %1795 = vmatpush3.bf16.msra.mxu0 %v2231_v40  ;;  %v1134_v44 = vsel %vm891_vm7, %v1920_v29, 0 }
  0x3d   : > { %v726_v45 = vor.u32 %v725_v30, %v721_v24  ;;  %v849_v46 = vshll.u32 %v633_v31, 16  ;;  %v842_v49 = vshrl.u32 %v2213_v19, 16  ;;  %v846_v50 = vrot.slane %v844_v33, 1  ;;  %1866 = vmatprep.subr.msk.bf16.mxu1 %vm891_vm7, %v1919_v17  ;;  %1867 = vmatprep.subr.msk.bf16.mxu0 %vm891_vm7, %v1920_v29 }
  0x3e   : > { %v586_v47 = vshrl.u32 %v1678_v37, 16  ;;  %v589_v48 = vshll.u32 %v1678_v37, 16  ;;  %v857_v51 = vrot.slane %v2213_v19, 1  ;;  %v858_v52 = vrot.slane %v633_v31, 1 }
  0x3f   : > { %742 = vrot.lane.b32.xlu0 %v707_v32, %s1961_s8  ;;  %801 = vrot.lane.b32.xlu1 %v785_v6, %s1962_s28  ;;  %v731_v54 = vsel %vm635_vm4, %v726_v45, %v730_v42  ;;  %v851_v55 = vrot.slane %v849_v46, 1  ;;  %v847_v59 = vor.u32 %v846_v50, %v842_v49 }
  0x40   : > { %v588_v53 = vrot.slane %v586_v47, 7  ;;  %v859_v60 = vsel %vm764_vm5, %v857_v51, %v858_v52 }
  0x41   : > { %v852_v5 = vsel %vm635_vm4, %v847_v59, %v851_v55 }
  0x42   : > { %v591_v56 = vor.u32 %v589_v48, %v588_v53  ;;  %v634_v58 = vsel %vm2057_vm2, %v588_v53, 0 }
  0x43   : > { %799 = vrot.lane.b32.xlu0 %v782_v41, %s1962_s28  ;;  %803 = vrot.lane.b32.xlu1 %v788_v43, %s1962_s28  ;;  %v1107_v61 = vshll.u32 %v634_v58, 16  ;;  %v1116_v62 = vrot.slane %v634_v58, 1  ;;  %v2322_v58 = vld [vmem:[%s2439_s4] ss:$0 sm:$0xff] }
  0x44   : > { %v2251_v63 = vsel %vm2057_vm2, 0, %v591_v56 }
  0x45   : > { %v1100_v0 = vshrl.u32 %v2251_v63, 16  ;;  %v1102_v3 = vshll.u32 %v2251_v63, 16  ;;  %v1115_v4 = vrot.slane %v2251_v63, 1  ;;  %v1109_v7 = vrot.slane %v1107_v61, 1 }
  0x47   : > { %746 = vrot.lane.b32.xlu0 %v731_v54, %s1961_s8  ;;  %860 = vrot.lane.b32.xlu1 %v859_v60, %s1962_s28  ;;  %v1104_v6 = vrot.slane %v1102_v3, 1  ;;  %v1117_v8 = vsel %vm764_vm5, %v1115_v4, %v1116_v62 }
  0x49   : > { %v1105_v9 = vor.u32 %v1104_v6, %v1100_v0 }
  0x4b   : > { %853 = vrot.lane.b32.xlu0 %v852_v5, %s1961_s8  ;;  %1118 = vrot.lane.b32.xlu1 %v1117_v8, %s1962_s28  ;;  %v1110_v10 = vsel %vm635_vm4, %v1105_v9, %v1109_v7 }
  0x4f   : > { %1111 = vrot.lane.b32.xlu0 %v1110_v10, %s1961_s8 }
  0x98   : > { %v737_v11 = vpop.permute.xlu1 %736  ;;  %v735_v12 = vpop.permute.xlu0 %734 }
  0x99   : > { %v809_v21 = vsel %vm805_vm9, %v2084_v27, %v735_v12  ;;  %v811_v24 = vsel %vm805_vm9, %v2077_v20, %v737_v11 }
  0x9d   : > { %v790_v14 = vpop.permute.xlu1 %789 }
  0xa1   : > { %v733_v15 = vpop.permute.xlu0 %732  ;;  %v794_v16 = vpop.permute.xlu1 %793 }
  0xa2   : > { %v807_v17 = vsel %vm805_vm9, %v2127_v2, %v733_v15  ;;  %v828_v26 = vsel %vm822_vm8, %v811_v24, %v794_v16 }
  0xa3   : > { %v824_v18 = vsel %vm822_vm8, %v807_v17, %v790_v14 }
  0xa4   : > { %1796 = vmatprep.mubr.msk.bf16.mxu0 %vm874_vm10, %v824_v18 }
  0xa5   : > { %v792_v22 = vpop.permute.xlu0 %791  ;;  %v741_v23 = vpop.permute.xlu1 %740 }
  0xa6   : > { %v826_v25 = vsel %vm822_vm8, %v809_v21, %v792_v22  ;;  %v815_v20 = vsel %vm805_vm9, %v2096_v38, %v741_v23 }
  0xa7   : > { %1778 = vmatprep.mubr.msk.bf16.mxu1 %vm874_vm10, %v826_v25  ;;  %1797 = vmatmul.mubr.msk.bf16.vlgmr.msra.gmra.mrb[0].mxu0 %vm874_vm10, %v826_v25 }
  0xa8   : > { %1779 = vmatmul.mubr.msk.bf16.vlgmr.msra.gmra.mrb[0].mxu1 %vm874_vm10, %v828_v26  ;;  %1800 = vmatprep.mubr.msk.bf16.mxu0 %vm874_vm10, %v828_v26 }
  0xa9   : > { %1831 = vmatpush3.bf16.msra.mxu1 %v2231_v40  ;;  %1813 = vmatpush3.bf16.msra.mxu0 %v1134_v44  ;;  %v739_v27 = vpop.permute.xlu0 %738  ;;  %v798_v2 = vpop.permute.xlu1 %797 }
  0xaa   : > { %v813_v28 = vsel %vm805_vm9, %v2143_v13, %v739_v27  ;;  %v832_v32 = vsel %vm822_vm8, %v815_v20, %v798_v2 }
  0xad   : > { %v796_v29 = vpop.permute.xlu0 %795  ;;  %v745_v30 = vpop.permute.xlu1 %744 }
  0xae   : > { %v830_v31 = vsel %vm822_vm8, %v813_v28, %v796_v29  ;;  %v819_v38 = vsel %vm805_vm9, %v2160_v34, %v745_v30 }
  0xaf   : > { %1782 = vmatprep.mubr.msk.bf16.mxu1 %vm874_vm10, %v830_v31  ;;  %1801 = vmatmul.mubr.msk.bf16.gmra.mrb[4].mxu0 %vm874_vm10, %v830_v31 }
  0xb0   : > { %1783 = vmatmul.mubr.msk.bf16.gmra.mrb[4].mxu1 %vm874_vm10, %v832_v32  ;;  %1814 = vmatprep.mubr.msk.bf16.mxu0 %vm874_vm10, %v828_v26 }
  0xb1   : > { %v743_v33 = vpop.permute.xlu0 %742  ;;  %v802_v35 = vpop.permute.xlu1 %801 }
  0xb2   : > { %v817_v13 = vsel %vm805_vm9, %v2181_v57, %v743_v33  ;;  %v836_v40 = vsel %vm822_vm8, %v819_v38, %v802_v35 }
  0xb5   : > { %v800_v36 = vpop.permute.xlu0 %799  ;;  %v804_v39 = vpop.permute.xlu1 %803 }
  0xb6   : > { %v834_v37 = vsel %vm822_vm8, %v817_v13, %v800_v36 }
  0xb7   : > { %1786 = vmatprep.mubr.msk.bf16.mxu1 %vm874_vm10, %v834_v37  ;;  %1815 = vmatmul.mubr.msk.bf16.vlgmr.msra.gmra.mrb[0].mxu0 %vm874_vm10, %v830_v31 }
  0xb8   : > { %1787 = vmatmul.mubr.msk.bf16.gmra.mrb[8].mxu1 %vm874_vm10, %v836_v40  ;;  %1818 = vmatprep.mubr.msk.bf16.mxu0 %vm874_vm10, %v832_v32 }
  0xb9   : > { %v747_v41 = vpop.permute.xlu0 %746  ;;  %v861_v42 = vpop.permute.xlu1 %860 }
  0xba   : > { %v821_v34 = vsel %vm805_vm9, %v2191_v1, %v747_v41 }
  0xbb   : > { %v838_v57 = vsel %vm822_vm8, %v821_v34, %v804_v39 }
  0xbc   : > { %1790 = vmatprep.mubr.msk.bf16.mxu1 %vm874_vm10, %v838_v57 }
  0xbd   : > { %v854_v43 = vpop.permute.xlu0 %853  ;;  %v1119_v46 = vpop.permute.xlu1 %1118 }
  0xbe   : > { %v863_v44 = vsel %vm805_vm9, %v2213_v19, %v854_v43 }
  0xbf   : > { %v865_v45 = vsel %vm822_vm8, %v863_v44, %v861_v42  ;;  %1819 = vmatmul.mubr.msk.bf16.gmra.mrb[4].mxu0 %vm874_vm10, %v834_v37 }
  0xc0   : > { %1791 = vmatmul.mubr.msk.bf16.gmra.mrb[12].mxu1 %vm874_vm10, %v865_v45  ;;  %1822 = vmatprep.mubr.msk.bf16.mxu0 %vm874_vm10, %v836_v40 }
  0xc1   : > { %1804 = vmatprep.mubr.msk.bf16.mxu1 %vm874_vm10, %v832_v32  ;;  %v1112_v1 = vpop.permute.xlu0 %1111 }
  0xc2   : > { %v1121_v19 = vsel %vm805_vm9, %v2251_v63, %v1112_v1 }
  0xc3   : > { %v1123_v47 = vsel %vm822_vm8, %v1121_v19, %v1119_v46 }
  0xc7   : > { %1823 = vmatmul.mubr.msk.bf16.gmra.mrb[8].mxu0 %vm874_vm10, %v838_v57 }
  0xc8   : > { %1805 = vmatmul.mubr.msk.bf16.vlgmr.msra.gmra.mrb[8].mxu1 %vm874_vm10, %v834_v37  ;;  %1826 = vmatprep.mubr.msk.bf16.mxu0 %vm874_vm10, %v865_v45 }
  0xc9   : > { %1808 = vmatprep.mubr.msk.bf16.mxu1 %vm874_vm10, %v836_v40 }
  0xcf   : > { %1827 = vmatmul.mubr.msk.bf16.gmra.mrb[12].mxu0 %vm874_vm10, %v1123_v47 }
  0xd0   : > { %1809 = vmatmul.mubr.msk.bf16.gmra.mrb[12].mxu1 %vm874_vm10, %v838_v57 }
 0x17b   : > { %v1780_v48 = vpop.f32.mrb[0].mxu1 }
 0x17c   : > { %v929_v49 = vpop.f32.mrb[1].mxu1 }
 0x17d   : > { %v1781_v50 = vpop.f32.mrb[2].mxu1 }
 0x17e   : > { %v932_v51 = vpop.f32.mrb[3].mxu1 }
 0x183   : > { %v1784_v52 = vpop.f32.mrb[4].mxu1 }
 0x184   : > { %v945_v53 = vpop.f32.mrb[5].mxu1 }
 0x185   : > { %v1785_v54 = vpop.f32.mrb[6].mxu1 }
 0x186   : > { %v948_v55 = vpop.f32.mrb[7].mxu1 }
 0x18a   : > { %v1816_v56 = vpop.f32.mrb[0].mxu0 }
 0x18b   : > { %v1832_v59 = vadd.f32 %v1816_v56, %v1780_v48  ;;  %v1170_v60 = vpop.f32.mrb[1].mxu0 }
 0x18c   : > { %v1833_v61 = vadd.f32 %v1170_v60, %v929_v49  ;;  %v1817_v62 = vpop.f32.mrb[2].mxu0 }
 0x18d   : > { %v1258_v63 = vadd.f32 %v1832_v59, %v2322_v58  ;;  %v1834_v0 = vadd.f32 %v1817_v62, %v1781_v50  ;;  %v1173_v3 = vpop.f32.mrb[3].mxu0 }
 0x18e   : > { %v1256_v4 = vadd.f32 %v1833_v61, %v2322_v58  ;;  %v1835_v5 = vadd.f32 %v1173_v3, %v932_v51 }
 0x18f   : > { %v1735_v6 = vpack.c.bf16 %v1258_v63, %v1258_v63  ;;  %v1259_v7 = vadd.f32 %v1834_v0, %v2322_v58  ;;  %v1392_v11 = vmul.f32 %v1258_v63, %v1258_v63  ;;  %v1356_v25 = vsel %vm805_vm9, %v1258_v63, 0.0 }
 0x190   : > { %v1733_v8 = vpack.c.bf16 %v1256_v4, %v1256_v4  ;;  %v1390_v9 = vmul.f32 %v1256_v4, %v1256_v4  ;;  %v1257_v10 = vadd.f32 %v1835_v5, %v2322_v58  ;;  %v1353_v14 = vsel %vm805_vm9, %v1256_v4, 0.0 }
 0x191   : > { %1339 = vst.msk [vmem:[%s2330_s13 + $0x8] sm:$0xf] %vm1336_vm11, %v1735_v6  ;;  %v1736_v12 = vpack.c.bf16 %v1259_v7, %v1259_v7  ;;  %v1393_v21 = vmul.f32 %v1259_v7, %v1259_v7  ;;  %v1409_v33 = vsel %vm805_vm9, %v1392_v11, 0.0  ;;  %v1358_v13 = vsel %vm805_vm9, %v1259_v7, 0.0 }
 0x192   : > { %1337 = vst.msk [vmem:[%s2330_s13] sm:$0xf] %vm1336_vm11, %v1733_v8  ;;  %v1734_v15 = vpack.c.bf16 %v1257_v10, %v1257_v10  ;;  %v1354_v16 = vsel %vm805_vm9, %v1257_v10, 0.0  ;;  %v1391_v17 = vmul.f32 %v1257_v10, %v1257_v10  ;;  %v1820_v18 = vpop.f32.mrb[4].mxu0  ;;  %v1406_v26 = vsel %vm805_vm9, %v1390_v9, 0.0 }
 0x193   : > { %1340 = vst.msk [vmem:[%s2330_s13 + $0xc] sm:$0xf] %vm1336_vm11, %v1736_v12  ;;  %v1355_v22 = vadd.f32 %v1354_v16, %v1353_v14  ;;  %v1836_v23 = vadd.f32 %v1820_v18, %v1784_v52  ;;  %v1186_v24 = vpop.f32.mrb[5].mxu0  ;;  %v1411_v36 = vsel %vm805_vm9, %v1393_v21, 0.0 }
 0x194   : > { %1338 = vst.msk [vmem:[%s2330_s13 + $0x4] sm:$0xf] %vm1336_vm11, %v1734_v15  ;;  %v1407_v27 = vsel %vm805_vm9, %v1391_v17, 0.0  ;;  %v1837_v2 = vadd.f32 %v1186_v24, %v945_v53  ;;  %v1821_v20 = vpop.f32.mrb[6].mxu0 }
 0x195   : > { %v1357_v28 = vadd.f32 %v1356_v25, %v1355_v22  ;;  %v1408_v29 = vadd.f32 %v1407_v27, %v1406_v26  ;;  %v1262_v30 = vadd.f32 %v1836_v23, %v2322_v58  ;;  %v1838_v31 = vadd.f32 %v1821_v20, %v1785_v54  ;;  %v1189_v32 = vpop.f32.mrb[7].mxu0 }
 0x196   : > { %v1260_v35 = vadd.f32 %v1837_v2, %v2322_v58  ;;  %v1839_v38 = vadd.f32 %v1189_v32, %v948_v55 }
 0x197   : > { %v1410_v37 = vadd.f32 %v1409_v33, %v1408_v29  ;;  %v1739_v39 = vpack.c.bf16 %v1262_v30, %v1262_v30  ;;  %v1359_v41 = vadd.f32 %v1358_v13, %v1357_v28  ;;  %v1263_v43 = vadd.f32 %v1838_v31, %v2322_v58 }
 0x198   : > { %v1737_v40 = vpack.c.bf16 %v1260_v35, %v1260_v35  ;;  %v1360_v34 = vsel %vm805_vm9, %v1260_v35, 0.0  ;;  %v1394_v57 = vmul.f32 %v1260_v35, %v1260_v35  ;;  %v1261_v44 = vadd.f32 %v1839_v38, %v2322_v58 }
 0x199   : > { %1343 = vst.msk [vmem:[%s2330_s13 + $0x18] sm:$0xf] %vm1336_vm11, %v1739_v39  ;;  %v1412_v42 = vadd.f32 %v1411_v36, %v1410_v37  ;;  %v1361_v45 = vadd.f32 %v1360_v34, %v1359_v41  ;;  %v1396_v46 = vmul.f32 %v1262_v30, %v1262_v30  ;;  %v1740_v48 = vpack.c.bf16 %v1263_v43, %v1263_v43 }
 0x19a   : > { %1341 = vst.msk [vmem:[%s2330_s13 + $0x10] sm:$0xf] %vm1336_vm11, %v1737_v40  ;;  %v1413_v1 = vsel %vm805_vm9, %v1394_v57, 0.0  ;;  %v1824_v19 = vpop.f32.mrb[8].mxu0  ;;  %v1738_v51 = vpack.c.bf16 %v1261_v44, %v1261_v44  ;;  %v1362_v52 = vsel %vm805_vm9, %v1261_v44, 0.0  ;;  %v1395_v53 = vmul.f32 %v1261_v44, %v1261_v44 }
 0x19b   : > { %v1414_v47 = vadd.f32 %v1413_v1, %v1412_v42  ;;  %v1806_v49 = vpop.f32.mrb[8].mxu1  ;;  %v1202_v50 = vpop.f32.mrb[9].mxu0  ;;  %v1364_v59 = vsel %vm805_vm9, %v1262_v30, 0.0  ;;  %1344 = vst.msk [vmem:[%s2330_s13 + $0x1c] sm:$0xf] %vm1336_vm11, %v1740_v48  ;;  %v1363_v60 = vadd.f32 %v1362_v52, %v1361_v45  ;;  %v1397_v0 = vmul.f32 %v1263_v43, %v1263_v43 }
 0x19c   : > { %v1840_v54 = vadd.f32 %v1824_v19, %v1806_v49  ;;  %v1068_v55 = vpop.f32.mrb[9].mxu1  ;;  %v1825_v56 = vpop.f32.mrb[10].mxu0  ;;  %1342 = vst.msk [vmem:[%s2330_s13 + $0x14] sm:$0xf] %vm1336_vm11, %v1738_v51  ;;  %v1415_v3 = vsel %vm805_vm9, %v1395_v53, 0.0  ;;  %v1417_v11 = vsel %vm805_vm9, %v1396_v46, 0.0 }
 0x19d   : > { %v1841_v61 = vadd.f32 %v1202_v50, %v1068_v55  ;;  %v1807_v62 = vpop.f32.mrb[10].mxu1  ;;  %v1205_v63 = vpop.f32.mrb[11].mxu0  ;;  %v1365_v7 = vadd.f32 %v1364_v59, %v1363_v60  ;;  %v1416_v8 = vadd.f32 %v1415_v3, %v1414_v47  ;;  %v1366_v12 = vsel %vm805_vm9, %v1263_v43, 0.0 }
 0x19e   : > { %v1266_v4 = vadd.f32 %v1840_v54, %v2322_v58  ;;  %v1842_v5 = vadd.f32 %v1825_v56, %v1807_v62  ;;  %v1071_v6 = vpop.f32.mrb[11].mxu1  ;;  %v1419_v22 = vsel %vm805_vm9, %v1397_v0, 0.0 }
 0x19f   : > { %v1264_v9 = vadd.f32 %v1841_v61, %v2322_v58  ;;  %v1843_v10 = vadd.f32 %v1205_v63, %v1071_v6  ;;  %v1418_v16 = vadd.f32 %v1417_v11, %v1416_v8  ;;  %v1367_v18 = vadd.f32 %v1366_v12, %v1365_v7 }
 0x1a0   : > { %v1743_v14 = vpack.c.bf16 %v1266_v4, %v1266_v4  ;;  %v1267_v15 = vadd.f32 %v1842_v5, %v2322_v58  ;;  %v1400_v33 = vmul.f32 %v1266_v4, %v1266_v4  ;;  %v1372_v42 = vsel %vm805_vm9, %v1266_v4, 0.0 }
 0x1a1   : > { %v1741_v17 = vpack.c.bf16 %v1264_v9, %v1264_v9  ;;  %v1368_v21 = vsel %vm805_vm9, %v1264_v9, 0.0  ;;  %v1398_v23 = vmul.f32 %v1264_v9, %v1264_v9  ;;  %v1420_v27 = vadd.f32 %v1419_v22, %v1418_v16 }
 0x1a2   : > { %1347 = vst.msk [vmem:[%s2330_s13 + $0x28] sm:$0xf] %vm1336_vm11, %v1743_v14  ;;  %v1744_v24 = vpack.c.bf16 %v1267_v15, %v1267_v15  ;;  %v1828_v25 = vpop.f32.mrb[12].mxu0  ;;  %v1369_v26 = vadd.f32 %v1368_v21, %v1367_v18  ;;  %v1265_v2 = vadd.f32 %v1843_v10, %v2322_v58  ;;  %v1401_v45 = vmul.f32 %v1267_v15, %v1267_v15 }
 0x1a3   : > { %1345 = vst.msk [vmem:[%s2330_s13 + $0x20] sm:$0xf] %vm1336_vm11, %v1741_v17  ;;  %v1810_v20 = vpop.f32.mrb[12].mxu1  ;;  %v1218_v28 = vpop.f32.mrb[13].mxu0  ;;  %v1421_v29 = vsel %vm805_vm9, %v1398_v23, 0.0  ;;  %v1374_v47 = vsel %vm805_vm9, %v1267_v15, 0.0 }
 0x1a4   : > { %1348 = vst.msk [vmem:[%s2330_s13 + $0x2c] sm:$0xf] %vm1336_vm11, %v1744_v24  ;;  %v1844_v30 = vadd.f32 %v1828_v25, %v1810_v20  ;;  %v1084_v31 = vpop.f32.mrb[13].mxu1  ;;  %v1829_v32 = vpop.f32.mrb[14].mxu0  ;;  %v1422_v35 = vadd.f32 %v1421_v29, %v1420_v27  ;;  %v1742_v38 = vpack.c.bf16 %v1265_v2, %v1265_v2  ;;  %v1370_v13 = vsel %vm805_vm9, %v1265_v2, 0.0 }
 0x1a5   : > { %v1811_v36 = vpop.f32.mrb[14].mxu1  ;;  %v1221_v37 = vpop.f32.mrb[15].mxu0  ;;  %v1371_v39 = vadd.f32 %v1370_v13, %v1369_v26  ;;  %v1399_v40 = vmul.f32 %v1265_v2, %v1265_v2  ;;  %v1845_v34 = vadd.f32 %v1218_v28, %v1084_v31  ;;  %v1425_v51 = vsel %vm805_vm9, %v1400_v33, 0.0 }
 0x1a6   : > { %v1270_v41 = vadd.f32 %v1844_v30, %v2322_v58  ;;  %v1087_v57 = vpop.f32.mrb[15].mxu1  ;;  %1346 = vst.msk [vmem:[%s2330_s13 + $0x24] sm:$0xf] %vm1336_vm11, %v1742_v38  ;;  %v1846_v43 = vadd.f32 %v1829_v32, %v1811_v36  ;;  %v1427_v59 = vsel %vm805_vm9, %v1401_v45, 0.0 }
 0x1a7   : > { %v1847_v44 = vadd.f32 %v1221_v37, %v1087_v57  ;;  %v1373_v1 = vadd.f32 %v1372_v42, %v1371_v39  ;;  %v1423_v19 = vsel %vm805_vm9, %v1399_v40, 0.0  ;;  %v1268_v49 = vadd.f32 %v1845_v34, %v2322_v58 }
 0x1a8   : > { %v1747_v46 = vpack.c.bf16 %v1270_v41, %v1270_v41  ;;  %v1424_v48 = vadd.f32 %v1423_v19, %v1422_v35  ;;  %v1271_v50 = vadd.f32 %v1846_v43, %v2322_v58  ;;  %v1404_v4 = vmul.f32 %v1270_v41, %v1270_v41 }
 0x1a9   : > { %v1375_v52 = vadd.f32 %v1374_v47, %v1373_v1  ;;  %v1269_v53 = vadd.f32 %v1847_v44, %v2322_v58  ;;  %v1745_v55 = vpack.c.bf16 %v1268_v49, %v1268_v49  ;;  %v1376_v56 = vsel %vm805_vm9, %v1268_v49, 0.0 }
 0x1aa   : > { %1351 = vst.msk [vmem:[%s2330_s13 + $0x38] sm:$0xf] %vm1336_vm11, %v1747_v46  ;;  %v1426_v54 = vadd.f32 %v1425_v51, %v1424_v48  ;;  %v1402_v61 = vmul.f32 %v1268_v49, %v1268_v49  ;;  %v1748_v62 = vpack.c.bf16 %v1271_v50, %v1271_v50  ;;  %v1380_v7 = vsel %vm805_vm9, %v1270_v41, 0.0 }
 0x1ab   : > { %v1377_v60 = vadd.f32 %v1376_v56, %v1375_v52  ;;  %1349 = vst.msk [vmem:[%s2330_s13 + $0x30] sm:$0xf] %vm1336_vm11, %v1745_v55  ;;  %v1746_v0 = vpack.c.bf16 %v1269_v53, %v1269_v53  ;;  %v1378_v3 = vsel %vm805_vm9, %v1269_v53, 0.0  ;;  %v1403_v6 = vmul.f32 %v1269_v53, %v1269_v53 }
 0x1ac   : > { %v1428_v63 = vadd.f32 %v1427_v59, %v1426_v54  ;;  %v1429_v5 = vsel %vm805_vm9, %v1402_v61, 0.0  ;;  %1352 = vst.msk [vmem:[%s2330_s13 + $0x3c] sm:$0xf] %vm1336_vm11, %v1748_v62  ;;  %v1405_v9 = vmul.f32 %v1271_v50, %v1271_v50  ;;  %v1382_v12 = vsel %vm805_vm9, %v1271_v50, 0.0 }
 0x1ad   : > { %v1379_v58 = vadd.f32 %v1378_v3, %v1377_v60  ;;  %1350 = vst.msk [vmem:[%s2330_s13 + $0x34] sm:$0xf] %vm1336_vm11, %v1746_v0  ;;  %v1431_v11 = vsel %vm805_vm9, %v1403_v6, 0.0  ;;  %v1433_v15 = vsel %vm805_vm9, %v1404_v4, 0.0 }
 0x1ae   : > { %v1430_v8 = vadd.f32 %v1429_v5, %v1428_v63  ;;  %v1435_v18 = vsel %vm805_vm9, %v1405_v9, 0.0 }
 0x1af   : > { %v1381_v10 = vadd.f32 %v1380_v7, %v1379_v58 }
 0x1b0   : > { %v1432_v14 = vadd.f32 %v1431_v11, %v1430_v8 }
 0x1b1   : > { %v1383_v16 = vadd.f32 %v1382_v12, %v1381_v10 }
 0x1b2   : > { %v1434_v17 = vadd.f32 %v1433_v15, %v1432_v14 }
 0x1b3   : > { %v1384_v2 = vrot.slane %v1383_v16, 4 }
 0x1b4   : > { %v1436_v21 = vadd.f32 %v1435_v18, %v1434_v17 }
 0x1b5   : > { %v1385_v20 = vadd.f32 %v1384_v2, %v1383_v16 }
 0x1b6   : > { %v1437_v22 = vrot.slane %v1436_v21, 4 }
 0x1b7   : > { %v1386_v28 = vrot.slane %v1385_v20, 2 }
 0x1b8   : > { %v1438_v23 = vadd.f32 %v1437_v22, %v1436_v21 }
 0x1b9   : > { %v1387_v29 = vadd.f32 %v1386_v28, %v1385_v20 }
 0x1ba   : > { %v1439_v24 = vrot.slane %v1438_v23, 2 }
 0x1bb   : > { %v1388_v30 = vrot.slane %v1387_v29, 1 }
 0x1bc   : > { %v1440_v25 = vadd.f32 %v1439_v24, %v1438_v23 }
 0x1bd   : > { %v1389_v31 = vadd.f32 %v1388_v30, %v1387_v29 }
 0x1be   : > { %v1441_v26 = vrot.slane %v1440_v25, 1 }
 0x1c0   : > { %v1442_v27 = vadd.f32 %v1441_v26, %v1440_v25 }
 0x1c2   : > { %1444 = vrot.lane.b32.xlu0 %v1442_v27, %s1961_s8 }
 0x234   : > { %v1445_v32 = vpop.permute.xlu0 %1444 }
 0x235   : > { %v1447_v33 = vsel %vm805_vm9, %v1389_v31, %v1445_v32 }
 0x236   : > { %1449 = vst.msk [vmem:[%s438_s16] sm:$0x1] %vm1448_vm12, %v1447_v33 }
 0x237 PF: > { %s17_s25 = sadd.s32 1, %s1959_s25   ;;  %s2447_s21 = smov %s1951_s23 }
 0x238   : > { %p14_p12 = scmp.ge.s32.totalorder %s17_s25, 6   ;;  %s2448_s22 = smov %s1955_s24 }
 0x239   : > { %s2449_s23 = smov %s2452_s26  ;;  %s2450_s24 = smov %s2456_s27 }
 0x23a   :  { %16 = sbr.rel (!%p14_p12) target bundleno = 3 (0x3), region = 88 }

</bundles_post_ra>
